<compile_context>
chip_gen: v7x
topology: tpu7x:2x2x1
jax: 0.10.0
libtpu: 0.0.40
codegen_flags: <defaults>
</compile_context>

<pallas_src>
import functools

import jax
import jax.numpy as jnp
from jax.experimental import pallas as pl
from jax.experimental.pallas import tpu as pltpu


GLOBAL_BEST_VALUE = -0.5   # mirrors the reference: compared against, never updated


# -----------------------------------------------------------------------------
# Fused multi-iteration kernel (grid axis == optimization iteration)
# -----------------------------------------------------------------------------
def _fused_iters_kernel(modes_ref,                       # SMEM i32 (n_iters,)
                        face0_ref, mean_ref, wm_ref, bm_ref, tgtu_ref,
                        we_ref, be_ref, bmface0_ref, bface0_ref, init_ref,
                        z_ref, sign_ref,
                        face_ref, best_full_ref, best_face_ref,
                        best_multi_face_ref, stats_ref,
                        prev_ind_sc, multi_cos_sc, gbest_sc,
                        *, n_valid, lr):
    it = pl.program_id(0)
    eps = jnp.float32(1e-8)

    # ---- first iteration: load the carried state into the resident buffers --
    @pl.when(it == 0)
    def _():
        face_ref[...] = face0_ref[...]
        best_multi_face_ref[...] = bmface0_ref[...]
        best_face_ref[...] = bface0_ref[...]
        prev_ind_sc[...] = init_ref[:, 0:1]     # previous best index (float, -1 = unset)
        multi_cos_sc[...] = init_ref[:, 1:2]    # best multistart cos
        gbest_sc[...] = init_ref[:, 2:3]        # global best cos

    # ---- face = state + mean ; emb = face @ Wm + bm (bf16 MXU, f32 acc) ------
    face_state = face_ref[...]                                          # (Bp, F)
    face = face_state + mean_ref[...]
    emb = jnp.dot(face.astype(jnp.bfloat16), wm_ref[...],
                  preferred_element_type=jnp.float32) + bm_ref[...]     # (Bp, E)

    # ---- cosine similarity vs. unit-norm target (rsqrt on the EUP) -----------
    dot = jnp.sum(emb * tgtu_ref[...], axis=-1, keepdims=True)          # (Bp, 1)
    na2 = jnp.sum(emb * emb, axis=-1, keepdims=True)                    # (Bp, 1)
    cos = dot * jax.lax.rsqrt(jnp.maximum(na2, eps * eps))              # (Bp, 1)

    # ---- mask padded rows; argmax / max fully in-kernel -----------------------
    bp = face_state.shape[0]
    row = jax.lax.broadcasted_iota(jnp.int32, (bp, 1), 0)
    row_f = row.astype(jnp.float32)
    valid = row < n_valid
    cos_m = jnp.where(valid, cos, jnp.float32(-1e30))
    best_cos = jnp.max(cos_m, axis=0, keepdims=True)                    # (1,1)
    is_best = jnp.logical_and(cos_m == best_cos, valid)
    best_ind_f = jnp.min(jnp.where(is_best, row_f, jnp.float32(bp)),
                         axis=0, keepdims=True)                         # (1,1)
    onehot = (row_f == best_ind_f).astype(jnp.float32)                  # (Bp,1)

    # ---- embedding-norm bookkeeping (uses PREVIOUS iteration's best index) ---
    prev_ind_f = prev_ind_sc[...]                                       # (1,1)
    valid_f = valid.astype(jnp.float32)
    norm_all = jnp.sqrt(jnp.sum(na2 * valid_f, axis=0, keepdims=True))
    prev_oh = jnp.logical_and(row_f == prev_ind_f, valid).astype(jnp.float32)
    norm_row = jnp.sqrt(jnp.sum(na2 * prev_oh, axis=0, keepdims=True))
    norm_sel = jnp.where(prev_ind_f < 0, norm_all, norm_row)            # (1,1)

    # ---- best-row extraction via one-hot sublane reduction --------------------
    best_state_row = jnp.sum(face_state * onehot, axis=0, keepdims=True)  # (1,F)
    best_full_ref[...] = best_state_row + mean_ref[...]                   # (1,F)

    # ---- base face for the update (mode from SMEM schedule) -------------------
    #   mode 0: current best row ; 1: restart (ground=0) ; 2: best-of-multistart
    mode = modes_ref[it]
    ext_cos = multi_cos_sc[...]                                         # (1,1)
    ext_face = best_multi_face_ref[...]                                 # (1,F)
    base_multi = jnp.where(best_cos > ext_cos, best_state_row, ext_face)
    base = jnp.where(mode == 1, jnp.zeros_like(best_state_row),
                     jnp.where(mode == 2, base_multi, best_state_row))

    # ---- eigenface decode + lr/sign scale + add + clamp -----------------------
    eig = jnp.dot(z_ref[...].astype(jnp.bfloat16), we_ref[...],
                  preferred_element_type=jnp.float32) + be_ref[...]     # (Bp, F)
    eig = (jnp.float32(lr) * sign_ref[...]) * eig
    face_ref[...] = jnp.clip(base + eig, -1.0, 1.0)

    # ---- global-best bookkeeping (threshold constant, as in the reference) ----
    improved = best_cos > jnp.float32(GLOBAL_BEST_VALUE)                # (1,1)
    gbest_sc[...] = jnp.where(improved, best_cos, gbest_sc[...])
    best_face_ref[...] = jnp.where(improved, best_state_row, best_face_ref[...])

    # ---- multistart carry update (only on restart / final iterations) ---------
    do_multi = mode >= 1
    take = jnp.logical_and(best_cos > ext_cos, do_multi)               # (1,1)
    multi_cos_sc[...] = jnp.where(take, best_cos, ext_cos)
    best_multi_face_ref[...] = jnp.where(take, best_state_row, ext_face)

    # ---- carry this iteration's best index; pack scalar results ---------------
    prev_ind_sc[...] = best_ind_f

    lane = jax.lax.broadcasted_iota(jnp.int32, (1, 128), 1)
    zero = jnp.zeros((1, 128), jnp.float32)
    stats_ref[...] = (jnp.where(lane == 0, best_cos, zero)
                      + jnp.where(lane == 1, norm_sel, zero)
                      + jnp.where(lane == 2, best_ind_f, zero)
                      + jnp.where(lane == 3, multi_cos_sc[...], zero)
                      + jnp.where(lane == 4, gbest_sc[...], zero))


def _build_runner(B, B_pad, F, E, NF, lr, sigma, n_iters):
    kernel = functools.partial(_fused_iters_kernel, n_valid=B, lr=float(lr))

    const2 = lambda it, modes: (0, 0)            # resident constants / carries
    per_it = lambda it, modes: (it, 0, 0)        # per-iteration random inputs

    fused = pl.pallas_call(
        kernel,
        out_shape=(jax.ShapeDtypeStruct((B_pad, F), jnp.float32),   # face state (carry)
                   jax.ShapeDtypeStruct((1, F), jnp.float32),       # best face (state+mean)
                   jax.ShapeDtypeStruct((1, F), jnp.float32),       # global best face (state)
                   jax.ShapeDtypeStruct((1, F), jnp.float32),       # best multistart face
                   jax.ShapeDtypeStruct((1, 128), jnp.float32)),    # packed scalars
        grid_spec=pltpu.PrefetchScalarGridSpec(
            num_scalar_prefetch=1,                                  # per-iteration modes
            grid=(n_iters,),
            in_specs=[pl.BlockSpec((B_pad, F), const2),             # initial face state
                      pl.BlockSpec((1, F), const2),                 # mean face
                      pl.BlockSpec((F, E), const2),                 # Wm (bf16, unpadded)
                      pl.BlockSpec((1, E), const2),                 # bm
                      pl.BlockSpec((1, E), const2),                 # unit target embedding
                      pl.BlockSpec((NF, F), const2),                # We (bf16, unpadded)
                      pl.BlockSpec((1, F), const2),                 # be
                      pl.BlockSpec((1, F), const2),                 # best_multi_face init
                      pl.BlockSpec((1, F), const2),                 # best_face init
                      pl.BlockSpec((1, 128), const2),               # scalar carries init
                      pl.BlockSpec((None, B_pad, NF), per_it),      # z  (per iteration)
                      pl.BlockSpec((None, B_pad, 1), per_it)],      # +-1 signs (per iter)
            out_specs=(pl.BlockSpec((B_pad, F), const2),
                       pl.BlockSpec((1, F), const2),
                       pl.BlockSpec((1, F), const2),
                       pl.BlockSpec((1, F), const2),
                       pl.BlockSpec((1, 128), const2)),
            scratch_shapes=[pltpu.VMEM((1, 1), jnp.float32),        # prev best index
                            pltpu.VMEM((1, 1), jnp.float32),        # best multistart cos
                            pltpu.VMEM((1, 1), jnp.float32)]),      # global best cos
        compiler_params=pltpu.CompilerParams(
            dimension_semantics=("arbitrary",)),
    )

    def run(face_state, best_multi_face, best_face, modes, key,
            prev_ind_f, best_multi_cos, global_best_cos,
            wm, bm, tgt_unit, mean_face, we, be):
        # TODO(synk): z / signs could be generated in-kernel with the TPU
        # hardware PRNG (pltpu.prng_seed + prng_random_bits), but that
        # primitive has no CPU/interpret lowering; drawing them here keeps the
        # whole block inside one jit with a single kernel dispatch.
        kz, ks = jax.random.split(key)
        z = sigma * jax.random.normal(kz, (n_iters, B_pad, NF), jnp.float32)
        signs = jnp.where(jax.random.bernoulli(ks, 0.5, (n_iters, B_pad, 1)),
                          jnp.float32(1.0), jnp.float32(-1.0))
        init = jnp.zeros((1, 128), jnp.float32)
        init = init.at[0, 0].set(prev_ind_f)
        init = init.at[0, 1].set(best_multi_cos)
        init = init.at[0, 2].set(global_best_cos)
        return fused(modes, face_state, mean_face, wm, bm, tgt_unit,
                     we, be, best_multi_face, best_face, init, z, signs)

    return jax.jit(run)


# -----------------------------------------------------------------------------
# Pipeline: host glue.  One pallas_call per *block* of iterations; all
# bookkeeping values stay as device arrays (no float()/int() round trips).
# -----------------------------------------------------------------------------
class PallasPipeline:
    def __init__(self, emb_target, wm, bm, we, be, mean_face,
                 batch_size=4, dim=16, lr=0.001, sigma=1.0, multistart=10,
                 iters_before_restart=100):
        f32 = jnp.float32
        self.B = batch_size
        self.B_pad = max(8, ((batch_size + 7) // 8) * 8)    # sublane tile
        self.dim = dim
        self.F = 3 * dim * dim                              # 768 = 6*128 (lane dense)
        self.E = wm.shape[1]                                 # unpadded (full-dim block)
        self.n_faces = we.shape[0]                           # unpadded (full-dim block)
        self.lr = lr
        self.sigma = sigma

        # Weights stay unpadded; matmul operands in bf16 for the MXU.
        self.wm = jnp.asarray(wm, jnp.bfloat16)               # (F, E)
        self.we = jnp.asarray(we, jnp.bfloat16)               # (NF, F)
        self.bm = jnp.asarray(bm, f32).reshape(1, self.E)
        self.be = jnp.asarray(be, f32).reshape(1, self.F)
        self.mean_face = jnp.asarray(mean_face, f32).reshape(1, self.F)
        tgt = jnp.asarray(emb_target, f32).reshape(-1)
        tgt_unit = tgt / jnp.maximum(jnp.linalg.norm(tgt), 1e-8)   # ||target|| folded once
        self.tgt_unit = tgt_unit.reshape(1, self.E)

        self.ground = 0.0
        self.face = jnp.zeros((self.B_pad, self.F), f32) + self.ground
        self.best_face = jnp.zeros((1, self.F), f32)
        self.best_ind = jnp.int32(-1)
        self.prev_ind_f = jnp.float32(-1.0)                 # -1 == "not set yet"
        self.best_value = jnp.float32(0.0)
        self.global_best_value = GLOBAL_BEST_VALUE          # never updated (mirrors original)
        self.global_best_cos = jnp.float32(-jnp.inf)
        self.best_cos = jnp.float32(1.0)
        self.norm = None
        self.objective = None

        self.multistart = multistart > 0
        self.N_restarts = multistart
        self.iters = 0
        self.iters_before_restart = iters_before_restart
        self.best_multi_face = jnp.zeros((1, self.F), f32)
        self.best_multi_cos = jnp.float32(-0.5)

        self._call_count = 0
        self._base_key = jax.random.PRNGKey(1234)
        self._runners = {}

    # ---- mode schedule uses only Python integers (no device syncs) -----------
    def _next_mode(self):
        mode = 0
        if self.multistart:
            self.iters += 1
            total = self.iters_before_restart * self.N_restarts
            is_restart = (self.iters % self.iters_before_restart == 0
                          and self.iters <= total)
            if self.iters == total:
                mode = 2                      # use best-of-multistart as base
            elif is_restart:
                mode = 1                      # restart from ground
        return mode

    def _get_runner(self, n_iters):
        if n_iters not in self._runners:
            self._runners[n_iters] = _build_runner(
                self.B, self.B_pad, self.F, self.E, self.n_faces,
                self.lr, self.sigma, n_iters)
        return self._runners[n_iters]

    def run_iters(self, n_iters):
        modes = jnp.asarray([self._next_mode() for _ in range(n_iters)], jnp.int32)
        key = jax.random.fold_in(self._base_key, self._call_count)
        self._call_count += 1

        runner = self._get_runner(n_iters)
        (new_state, best_full, best_face, best_multi_face, stats) = runner(
            self.face, self.best_multi_face, self.best_face, modes, key,
            self.prev_ind_f, self.best_multi_cos, self.global_best_cos,
            self.wm, self.bm, self.tgt_unit, self.mean_face, self.we, self.be)

        # Device-valued bookkeeping, all from the last iteration of the block.
        self.face = new_state
        self.best_face = best_face
        self.best_multi_face = best_multi_face
        self.best_cos = stats[0, 0]
        self.norm = stats[0, 1]
        self.prev_ind_f = stats[0, 2]
        self.best_ind = stats[0, 2].astype(jnp.int32)
        self.best_multi_cos = stats[0, 3]
        self.global_best_cos = stats[0, 4]
        self.best_value = self.best_cos
        self.objective = self.best_cos

        # `View` equivalent: pure metadata reshape of the winning flattened face.
        recon = best_full.reshape(3, self.dim, self.dim)
        return recon, self.best_cos

    def forward(self):
        return self.run_iters(1)

    __call__ = forward


# -----------------------------------------------------------------------------
# main
# -----------------------------------------------------------------------------
if __name__ == "__main__":
    B, DIM, E, NF = 4, 16, 32, 16           # batch, image dim, emb dim, n eigenfaces
    F = 3 * DIM * DIM

    key = jax.random.PRNGKey(0)
    k1, k2, k3, k4, k5, k6 = jax.random.split(key, 6)

    wm = 0.05 * jax.random.normal(k1, (F, E), jnp.float32)     # model "linear"
    bm = 0.01 * jax.random.normal(k2, (E,), jnp.float32)
    we = 0.05 * jax.random.normal(k3, (NF, F), jnp.float32)    # eigenface decoder
    be = 0.01 * jax.random.normal(k4, (F,), jnp.float32)
    emb_target = jax.random.normal(k5, (E,), jnp.float32)
    mean_face = 0.1 * jax.random.normal(k6, (3, DIM, DIM), jnp.float32)

    pipe = PallasPipeline(emb_target, wm, bm, we, be, mean_face,
                          batch_size=B, dim=DIM, lr=0.001, sigma=1.0,
                          multistart=2, iters_before_restart=4)

    # 8 optimization iterations in ONE pallas_call (weights stay VMEM-resident,
    # exercising restart (mode 1) and best-of-multistart (mode 2) paths) ...
    recon_face, best_cos_dev = pipe.run_iters(8)
    # ... plus one single-iteration launch via the same kernel for API parity.
    recon_face, best_cos_dev = pipe()

    recon_face = jax.block_until_ready(recon_face)
    _ = jax.block_until_ready(pipe.face)
    best_cos = float(best_cos_dev)          # single host read-out at the end

    assert recon_face.shape == (3, DIM, DIM)
    assert recon_face.dtype == jnp.float32
    assert isinstance(best_cos, float)
    # TODO(synk): GaussianBlur (blur_before/blur_after) and downsample/Upsample
    # branches are disabled by default in the reference module and are not
    # implemented here.
    print("KERNEL_OK")
</pallas_src>

<mosaic_0001>
module attributes {stable_mosaic.version = 11 : i64} {
  func.func @_fused_iters_kernel(%arg0: i32, %arg1: memref<8xi32, #tpu.memory_space<smem>>, %arg2: memref<8x768xf32, #tpu.memory_space<vmem>>, %arg3: memref<1x768xf32, #tpu.memory_space<vmem>>, %arg4: memref<768x32xbf16, #tpu.memory_space<vmem>>, %arg5: memref<1x32xf32, #tpu.memory_space<vmem>>, %arg6: memref<1x32xf32, #tpu.memory_space<vmem>>, %arg7: memref<16x768xbf16, #tpu.memory_space<vmem>>, %arg8: memref<1x768xf32, #tpu.memory_space<vmem>>, %arg9: memref<1x768xf32, #tpu.memory_space<vmem>>, %arg10: memref<1x768xf32, #tpu.memory_space<vmem>>, %arg11: memref<1x128xf32, #tpu.memory_space<vmem>>, %arg12: memref<1x8x16xf32, #tpu.memory_space<vmem>>, %arg13: memref<1x8x1xf32, #tpu.memory_space<vmem>>, %arg14: memref<8x768xf32, #tpu.memory_space<vmem>>, %arg15: memref<1x768xf32, #tpu.memory_space<vmem>>, %arg16: memref<1x768xf32, #tpu.memory_space<vmem>>, %arg17: memref<1x768xf32, #tpu.memory_space<vmem>>, %arg18: memref<1x128xf32, #tpu.memory_space<vmem>>, %arg19: memref<1x1xf32, #tpu.memory_space<vmem>>, %arg20: memref<1x1xf32, #tpu.memory_space<vmem>>, %arg21: memref<1x1xf32, #tpu.memory_space<vmem>>) attributes {dimension_semantics = [#tpu.dimension_semantics<arbitrary>], iteration_bounds = array<i64: 8>, scalar_prefetch = 1 : i64, scratch_operands = 3 : i64, tpu.core_type = #tpu.core_type<tc>, window_params = [{pipeline_mode = #tpu.pipeline_mode<synchronous>, transform_indices = @transform_0, window_bounds = array<i64: 8, 768>}, {pipeline_mode = #tpu.pipeline_mode<synchronous>, transform_indices = @transform_1, window_bounds = array<i64: 1, 768>}, {pipeline_mode = #tpu.pipeline_mode<synchronous>, transform_indices = @transform_2, window_bounds = array<i64: 768, 32>}, {pipeline_mode = #tpu.pipeline_mode<synchronous>, transform_indices = @transform_3, window_bounds = array<i64: 1, 32>}, {pipeline_mode = #tpu.pipeline_mode<synchronous>, transform_indices = @transform_4, window_bounds = array<i64: 1, 32>}, {pipeline_mode = #tpu.pipeline_mode<synchronous>, transform_indices = @transform_5, window_bounds = array<i64: 16, 768>}, {pipeline_mode = #tpu.pipeline_mode<synchronous>, transform_indices = @transform_6, window_bounds = array<i64: 1, 768>}, {pipeline_mode = #tpu.pipeline_mode<synchronous>, transform_indices = @transform_7, window_bounds = array<i64: 1, 768>}, {pipeline_mode = #tpu.pipeline_mode<synchronous>, transform_indices = @transform_8, window_bounds = array<i64: 1, 768>}, {pipeline_mode = #tpu.pipeline_mode<synchronous>, transform_indices = @transform_9, window_bounds = array<i64: 1, 128>}, {transform_indices = @transform_10, window_bounds = array<i64: 1, 8, 16>}, {transform_indices = @transform_11, window_bounds = array<i64: 1, 8, 1>}, {pipeline_mode = #tpu.pipeline_mode<synchronous>, transform_indices = @transform_12, window_bounds = array<i64: 8, 768>}, {pipeline_mode = #tpu.pipeline_mode<synchronous>, transform_indices = @transform_13, window_bounds = array<i64: 1, 768>}, {pipeline_mode = #tpu.pipeline_mode<synchronous>, transform_indices = @transform_14, window_bounds = array<i64: 1, 768>}, {pipeline_mode = #tpu.pipeline_mode<synchronous>, transform_indices = @transform_15, window_bounds = array<i64: 1, 768>}, {pipeline_mode = #tpu.pipeline_mode<synchronous>, transform_indices = @transform_16, window_bounds = array<i64: 1, 128>}]} {
    %c0_i32 = arith.constant 0 : i32
    %0 = arith.cmpi eq, %arg0, %c0_i32 : i32
    %1 = arith.extui %0 : i1 to i32
    %c0_i32_0 = arith.constant 0 : i32
    %2 = arith.cmpi ne, %1, %c0_i32_0 : i32
    scf.if %2 {
      %c0_76 = arith.constant 0 : index
      %c0_77 = arith.constant 0 : index
      %160 = vector.load %arg2[%c0_76, %c0_77] : memref<8x768xf32, #tpu.memory_space<vmem>>, vector<8x768xf32>
      %c0_78 = arith.constant 0 : index
      %c0_79 = arith.constant 0 : index
      %161 = vector.load %arg14[%c0_78, %c0_79] : memref<8x768xf32, #tpu.memory_space<vmem>>, vector<8x768xf32>
      tpu.vector_store %arg14[%c0_78, %c0_79], %160 {strides = array<i32>} : memref<8x768xf32, #tpu.memory_space<vmem>>, vector<8x768xf32>,
      %c0_80 = arith.constant 0 : index
      %c0_81 = arith.constant 0 : index
      %162 = vector.load %arg9[%c0_80, %c0_81] : memref<1x768xf32, #tpu.memory_space<vmem>>, vector<1x768xf32>
      %c0_82 = arith.constant 0 : index
      %c0_83 = arith.constant 0 : index
      %163 = vector.load %arg17[%c0_82, %c0_83] : memref<1x768xf32, #tpu.memory_space<vmem>>, vector<1x768xf32>
      tpu.vector_store %arg17[%c0_82, %c0_83], %162 {strides = array<i32>} : memref<1x768xf32, #tpu.memory_space<vmem>>, vector<1x768xf32>,
      %c0_84 = arith.constant 0 : index
      %c0_85 = arith.constant 0 : index
      %164 = vector.load %arg10[%c0_84, %c0_85] : memref<1x768xf32, #tpu.memory_space<vmem>>, vector<1x768xf32>
      %c0_86 = arith.constant 0 : index
      %c0_87 = arith.constant 0 : index
      %165 = vector.load %arg16[%c0_86, %c0_87] : memref<1x768xf32, #tpu.memory_space<vmem>>, vector<1x768xf32>
      tpu.vector_store %arg16[%c0_86, %c0_87], %164 {strides = array<i32>} : memref<1x768xf32, #tpu.memory_space<vmem>>, vector<1x768xf32>,
      %c0_88 = arith.constant 0 : index
      %c0_89 = arith.constant 0 : index
      %166 = vector.load %arg11[%c0_88, %c0_89] : memref<1x128xf32, #tpu.memory_space<vmem>>, vector<1x1xf32>
      %c0_90 = arith.constant 0 : index
      %c0_91 = arith.constant 0 : index
      %167 = vector.load %arg19[%c0_90, %c0_91] : memref<1x1xf32, #tpu.memory_space<vmem>>, vector<1x1xf32>
      tpu.vector_store %arg19[%c0_90, %c0_91], %166 {strides = array<i32>} : memref<1x1xf32, #tpu.memory_space<vmem>>, vector<1x1xf32>,
      %c0_92 = arith.constant 0 : index
      %c1 = arith.constant 1 : index
      %168 = vector.load %arg11[%c0_92, %c1] : memref<1x128xf32, #tpu.memory_space<vmem>>, vector<1x1xf32>
      %c0_93 = arith.constant 0 : index
      %c0_94 = arith.constant 0 : index
      %169 = vector.load %arg20[%c0_93, %c0_94] : memref<1x1xf32, #tpu.memory_space<vmem>>, vector<1x1xf32>
      tpu.vector_store %arg20[%c0_93, %c0_94], %168 {strides = array<i32>} : memref<1x1xf32, #tpu.memory_space<vmem>>, vector<1x1xf32>,
      %c0_95 = arith.constant 0 : index
      %c2 = arith.constant 2 : index
      %170 = vector.load %arg11[%c0_95, %c2] : memref<1x128xf32, #tpu.memory_space<vmem>>, vector<1x1xf32>
      %c0_96 = arith.constant 0 : index
      %c0_97 = arith.constant 0 : index
      %171 = vector.load %arg21[%c0_96, %c0_97] : memref<1x1xf32, #tpu.memory_space<vmem>>, vector<1x1xf32>
      tpu.vector_store %arg21[%c0_96, %c0_97], %170 {strides = array<i32>} : memref<1x1xf32, #tpu.memory_space<vmem>>, vector<1x1xf32>,
    } else {
    }
    %c0 = arith.constant 0 : index
    %c0_1 = arith.constant 0 : index
    %3 = vector.load %arg14[%c0, %c0_1] : memref<8x768xf32, #tpu.memory_space<vmem>>, vector<8x768xf32>
    %c0_2 = arith.constant 0 : index
    %c0_3 = arith.constant 0 : index
    %4 = vector.load %arg3[%c0_2, %c0_3] : memref<1x768xf32, #tpu.memory_space<vmem>>, vector<1x768xf32>
    %5 = vector.broadcast %4 : vector<1x768xf32> to vector<8x768xf32>
    %6 = arith.addf %3, %5 : vector<8x768xf32>
    %7 = arith.truncf %6 : vector<8x768xf32> to vector<8x768xbf16>
    %c0_4 = arith.constant 0 : index
    %c0_5 = arith.constant 0 : index
    %8 = vector.load %arg4[%c0_4, %c0_5] : memref<768x32xbf16, #tpu.memory_space<vmem>>, vector<768x32xbf16>
    %cst = arith.constant dense<0.000000e+00> : vector<8x32xf32>
    %9 = tpu.matmul %7, %8, %cst {dimension_numbers = #tpu.dot_dimension_numbers<[1], [0], [0], [1], [0, 0, 1, 1], [], []>} : vector<8x768xbf16>, vector<768x32xbf16>, vector<8x32xf32> -> vector<8x32xf32>
    %c0_6 = arith.constant 0 : index
    %c0_7 = arith.constant 0 : index
    %10 = vector.load %arg5[%c0_6, %c0_7] : memref<1x32xf32, #tpu.memory_space<vmem>>, vector<1x32xf32>
    %11 = vector.broadcast %10 : vector<1x32xf32> to vector<8x32xf32>
    %12 = arith.addf %9, %11 : vector<8x32xf32>
    %c0_8 = arith.constant 0 : index
    %c0_9 = arith.constant 0 : index
    %13 = vector.load %arg6[%c0_8, %c0_9] : memref<1x32xf32, #tpu.memory_space<vmem>>, vector<1x32xf32>
    %14 = vector.broadcast %13 : vector<1x32xf32> to vector<8x32xf32>
    %15 = arith.mulf %12, %14 : vector<8x32xf32>
    %cst_10 = arith.constant dense<0.000000e+00> : vector<8xf32>
    %16 = vector.multi_reduction <add>, %15, %cst_10 [1] : vector<8x32xf32> to vector<8xf32>
    %17 = vector.shape_cast %16 : vector<8xf32> to vector<8x1xf32>
    %18 = arith.mulf %12, %12 : vector<8x32xf32>
    %cst_11 = arith.constant dense<0.000000e+00> : vector<8xf32>
    %19 = vector.multi_reduction <add>, %18, %cst_11 [1] : vector<8x32xf32> to vector<8xf32>
    %20 = vector.shape_cast %19 : vector<8xf32> to vector<8x1xf32>
    %cst_12 = arith.constant 9.99999993E-9 : f32
    %cst_13 = arith.constant 9.99999993E-9 : f32
    %21 = arith.mulf %cst_12, %cst_13 : f32
    %22 = vector.broadcast %21 : f32 to vector<8x1xf32>
    %23 = arith.maximumf %20, %22 : vector<8x1xf32>
    %24 = math.rsqrt %23 : vector<8x1xf32>
    %25 = arith.mulf %17, %24 : vector<8x1xf32>
    %26 = tpu.iota {dimensions = array<i32: 0>} : vector<8x1xi32>
    %27 = arith.sitofp %26 : vector<8x1xi32> to vector<8x1xf32>
    %c4_i32 = arith.constant 4 : i32
    %28 = vector.broadcast %c4_i32 : i32 to vector<8x1xi32>
    %29 = arith.cmpi slt, %26, %28 : vector<8x1xi32>
    %cst_14 = arith.constant -1.000000e+30 : f32
    %30 = vector.broadcast %cst_14 : f32 to vector<8x1xf32>
    %31 = arith.select %29, %25, %30 : vector<8x1xi1>, vector<8x1xf32>
    %cst_15 = arith.constant dense<0xFF800000> : vector<1xf32>
    %32 = vector.multi_reduction <maximumf>, %31, %cst_15 [0] : vector<8x1xf32> to vector<1xf32>
    %33 = vector.shape_cast %32 : vector<1xf32> to vector<1x1xf32>
    %34 = vector.broadcast %33 : vector<1x1xf32> to vector<8x1xf32>
    %35 = arith.cmpf oeq, %31, %34 : vector<8x1xf32>
    %36 = arith.andi %35, %29 : vector<8x1xi1>
    %cst_16 = arith.constant 8.000000e+00 : f32
    %37 = vector.broadcast %cst_16 : f32 to vector<8x1xf32>
    %38 = arith.select %36, %27, %37 : vector<8x1xi1>, vector<8x1xf32>
    %cst_17 = arith.constant dense<0x7F800000> : vector<1xf32>
    %39 = vector.multi_reduction <minimumf>, %38, %cst_17 [0] : vector<8x1xf32> to vector<1xf32>
    %40 = vector.shape_cast %39 : vector<1xf32> to vector<1x1xf32>
    %41 = vector.broadcast %40 : vector<1x1xf32> to vector<8x1xf32>
    %42 = arith.cmpf oeq, %27, %41 : vector<8x1xf32>
    %43 = arith.extui %42 : vector<8x1xi1> to vector<8x1xi32>
    %44 = arith.sitofp %43 : vector<8x1xi32> to vector<8x1xf32>
    %c0_18 = arith.constant 0 : index
    %c0_19 = arith.constant 0 : index
    %45 = vector.load %arg19[%c0_18, %c0_19] : memref<1x1xf32, #tpu.memory_space<vmem>>, vector<1x1xf32>
    %46 = arith.extui %29 : vector<8x1xi1> to vector<8x1xi32>
    %47 = arith.sitofp %46 : vector<8x1xi32> to vector<8x1xf32>
    %48 = arith.mulf %20, %47 : vector<8x1xf32>
    %cst_20 = arith.constant dense<0.000000e+00> : vector<1xf32>
    %49 = vector.multi_reduction <add>, %48, %cst_20 [0] : vector<8x1xf32> to vector<1xf32>
    %50 = vector.shape_cast %49 : vector<1xf32> to vector<1x1xf32>
    %51 = math.sqrt %50 : vector<1x1xf32>
    %52 = vector.broadcast %45 : vector<1x1xf32> to vector<8x1xf32>
    %53 = arith.cmpf oeq, %27, %52 : vector<8x1xf32>
    %54 = arith.andi %53, %29 : vector<8x1xi1>
    %55 = arith.extui %54 : vector<8x1xi1> to vector<8x1xi32>
    %56 = arith.sitofp %55 : vector<8x1xi32> to vector<8x1xf32>
    %57 = arith.mulf %20, %56 : vector<8x1xf32>
    %cst_21 = arith.constant dense<0.000000e+00> : vector<1xf32>
    %58 = vector.multi_reduction <add>, %57, %cst_21 [0] : vector<8x1xf32> to vector<1xf32>
    %59 = vector.shape_cast %58 : vector<1xf32> to vector<1x1xf32>
    %60 = math.sqrt %59 : vector<1x1xf32>
    %cst_22 = arith.constant 0.000000e+00 : f32
    %61 = vector.broadcast %cst_22 : f32 to vector<1x1xf32>
    %62 = arith.cmpf olt, %45, %61 : vector<1x1xf32>
    %63 = arith.select %62, %51, %60 : vector<1x1xi1>, vector<1x1xf32>
    %64 = vector.broadcast %44 : vector<8x1xf32> to vector<8x768xf32>
    %65 = arith.mulf %3, %64 : vector<8x768xf32>
    %cst_23 = arith.constant dense<0.000000e+00> : vector<768xf32>
    %66 = vector.multi_reduction <add>, %65, %cst_23 [0] : vector<8x768xf32> to vector<768xf32>
    %67 = vector.shape_cast %66 : vector<768xf32> to vector<1x768xf32>
    %c0_24 = arith.constant 0 : index
    %c0_25 = arith.constant 0 : index
    %68 = vector.load %arg3[%c0_24, %c0_25] : memref<1x768xf32, #tpu.memory_space<vmem>>, vector<1x768xf32>
    %69 = arith.addf %67, %68 : vector<1x768xf32>
    %c0_26 = arith.constant 0 : index
    %c0_27 = arith.constant 0 : index
    %70 = vector.load %arg15[%c0_26, %c0_27] : memref<1x768xf32, #tpu.memory_space<vmem>>, vector<1x768xf32>
    tpu.vector_store %arg15[%c0_26, %c0_27], %69 {strides = array<i32>} : memref<1x768xf32, #tpu.memory_space<vmem>>, vector<1x768xf32>,
    %71 = arith.index_cast %arg0 : i32 to index
    %72 = memref.load %arg1[%71] : memref<8xi32, #tpu.memory_space<smem>>
    %c0_28 = arith.constant 0 : index
    %c0_29 = arith.constant 0 : index
    %73 = vector.load %arg20[%c0_28, %c0_29] : memref<1x1xf32, #tpu.memory_space<vmem>>, vector<1x1xf32>
    %c0_30 = arith.constant 0 : index
    %c0_31 = arith.constant 0 : index
    %74 = vector.load %arg17[%c0_30, %c0_31] : memref<1x768xf32, #tpu.memory_space<vmem>>, vector<1x768xf32>
    %75 = arith.cmpf ogt, %33, %73 : vector<1x1xf32>
    %76 = vector.shape_cast %75 : vector<1x1xi1> to vector<1x1xi1>
    %77 = vector.broadcast %76 : vector<1x1xi1> to vector<1x768xi1>
    %78 = arith.select %77, %67, %74 : vector<1x768xi1>, vector<1x768xf32>
    %c1_i32 = arith.constant 1 : i32
    %79 = arith.cmpi eq, %72, %c1_i32 : i32
    %cst_32 = arith.constant 0.000000e+00 : f32
    %80 = vector.broadcast %cst_32 : f32 to vector<1x768xf32>
    %c2_i32 = arith.constant 2 : i32
    %81 = arith.cmpi eq, %72, %c2_i32 : i32
    %82 = arith.select %81, %78, %67 : vector<1x768xf32>
    %83 = arith.select %79, %80, %82 : vector<1x768xf32>
    %c0_33 = arith.constant 0 : index
    %c0_34 = arith.constant 0 : index
    %c0_35 = arith.constant 0 : index
    %84 = vector.load %arg12[%c0_33, %c0_34, %c0_35] : memref<1x8x16xf32, #tpu.memory_space<vmem>>, vector<1x8x16xf32>
    %85 = vector.shape_cast %84 : vector<1x8x16xf32> to vector<8x16xf32>
    %86 = arith.truncf %85 : vector<8x16xf32> to vector<8x16xbf16>
    %c0_36 = arith.constant 0 : index
    %c0_37 = arith.constant 0 : index
    %87 = vector.load %arg7[%c0_36, %c0_37] : memref<16x768xbf16, #tpu.memory_space<vmem>>, vector<16x768xbf16>
    %cst_38 = arith.constant dense<0.000000e+00> : vector<8x768xf32>
    %88 = tpu.matmul %86, %87, %cst_38 {dimension_numbers = #tpu.dot_dimension_numbers<[1], [0], [0], [1], [0, 0, 1, 1], [], []>} : vector<8x16xbf16>, vector<16x768xbf16>, vector<8x768xf32> -> vector<8x768xf32>
    %c0_39 = arith.constant 0 : index
    %c0_40 = arith.constant 0 : index
    %89 = vector.load %arg8[%c0_39, %c0_40] : memref<1x768xf32, #tpu.memory_space<vmem>>, vector<1x768xf32>
    %90 = vector.broadcast %89 : vector<1x768xf32> to vector<8x768xf32>
    %91 = arith.addf %88, %90 : vector<8x768xf32>
    %c0_41 = arith.constant 0 : index
    %c0_42 = arith.constant 0 : index
    %c0_43 = arith.constant 0 : index
    %92 = vector.load %arg13[%c0_41, %c0_42, %c0_43] : memref<1x8x1xf32, #tpu.memory_space<vmem>>, vector<1x8x1xf32>
    %93 = vector.shape_cast %92 : vector<1x8x1xf32> to vector<8x1xf32>
    %cst_44 = arith.constant 1.000000e-03 : f32
    %94 = vector.broadcast %cst_44 : f32 to vector<8x1xf32>
    %95 = arith.mulf %94, %93 : vector<8x1xf32>
    %96 = vector.broadcast %95 : vector<8x1xf32> to vector<8x768xf32>
    %97 = arith.mulf %96, %91 : vector<8x768xf32>
    %98 = vector.broadcast %83 : vector<1x768xf32> to vector<8x768xf32>
    %99 = arith.addf %98, %97 : vector<8x768xf32>
    %cst_45 = arith.constant -1.000000e+00 : f32
    %cst_46 = arith.constant 1.000000e+00 : f32
    %100 = vector.broadcast %cst_45 : f32 to vector<8x768xf32>
    %101 = arith.maximumf %100, %99 : vector<8x768xf32>
    %102 = vector.broadcast %cst_46 : f32 to vector<8x768xf32>
    %103 = arith.minimumf %102, %101 : vector<8x768xf32>
    %c0_47 = arith.constant 0 : index
    %c0_48 = arith.constant 0 : index
    %104 = vector.load %arg14[%c0_47, %c0_48] : memref<8x768xf32, #tpu.memory_space<vmem>>, vector<8x768xf32>
    tpu.vector_store %arg14[%c0_47, %c0_48], %103 {strides = array<i32>} : memref<8x768xf32, #tpu.memory_space<vmem>>, vector<8x768xf32>,
    %cst_49 = arith.constant -5.000000e-01 : f32
    %105 = vector.broadcast %cst_49 : f32 to vector<1x1xf32>
    %106 = arith.cmpf ogt, %33, %105 : vector<1x1xf32>
    %c0_50 = arith.constant 0 : index
    %c0_51 = arith.constant 0 : index
    %107 = vector.load %arg21[%c0_50, %c0_51] : memref<1x1xf32, #tpu.memory_space<vmem>>, vector<1x1xf32>
    %108 = arith.select %106, %33, %107 : vector<1x1xi1>, vector<1x1xf32>
    %c0_52 = arith.constant 0 : index
    %c0_53 = arith.constant 0 : index
    %109 = vector.load %arg21[%c0_52, %c0_53] : memref<1x1xf32, #tpu.memory_space<vmem>>, vector<1x1xf32>
    tpu.vector_store %arg21[%c0_52, %c0_53], %108 {strides = array<i32>} : memref<1x1xf32, #tpu.memory_space<vmem>>, vector<1x1xf32>,
    %c0_54 = arith.constant 0 : index
    %c0_55 = arith.constant 0 : index
    %110 = vector.load %arg16[%c0_54, %c0_55] : memref<1x768xf32, #tpu.memory_space<vmem>>, vector<1x768xf32>
    %111 = vector.shape_cast %106 : vector<1x1xi1> to vector<1x1xi1>
    %112 = vector.broadcast %111 : vector<1x1xi1> to vector<1x768xi1>
    %113 = arith.select %112, %67, %110 : vector<1x768xi1>, vector<1x768xf32>
    %c0_56 = arith.constant 0 : index
    %c0_57 = arith.constant 0 : index
    %114 = vector.load %arg16[%c0_56, %c0_57] : memref<1x768xf32, #tpu.memory_space<vmem>>, vector<1x768xf32>
    tpu.vector_store %arg16[%c0_56, %c0_57], %113 {strides = array<i32>} : memref<1x768xf32, #tpu.memory_space<vmem>>, vector<1x768xf32>,
    %c1_i32_58 = arith.constant 1 : i32
    %115 = arith.cmpi sge, %72, %c1_i32_58 : i32
    %116 = arith.cmpf ogt, %33, %73 : vector<1x1xf32>
    %117 = vector.broadcast %115 : i1 to vector<1x1xi1>
    %118 = arith.andi %116, %117 : vector<1x1xi1>
    %119 = arith.select %118, %33, %73 : vector<1x1xi1>, vector<1x1xf32>
    %c0_59 = arith.constant 0 : index
    %c0_60 = arith.constant 0 : index
    %120 = vector.load %arg20[%c0_59, %c0_60] : memref<1x1xf32, #tpu.memory_space<vmem>>, vector<1x1xf32>
    tpu.vector_store %arg20[%c0_59, %c0_60], %119 {strides = array<i32>} : memref<1x1xf32, #tpu.memory_space<vmem>>, vector<1x1xf32>,
    %121 = vector.shape_cast %118 : vector<1x1xi1> to vector<1x1xi1>
    %122 = vector.broadcast %121 : vector<1x1xi1> to vector<1x768xi1>
    %123 = arith.select %122, %67, %74 : vector<1x768xi1>, vector<1x768xf32>
    %c0_61 = arith.constant 0 : index
    %c0_62 = arith.constant 0 : index
    %124 = vector.load %arg17[%c0_61, %c0_62] : memref<1x768xf32, #tpu.memory_space<vmem>>, vector<1x768xf32>
    tpu.vector_store %arg17[%c0_61, %c0_62], %123 {strides = array<i32>} : memref<1x768xf32, #tpu.memory_space<vmem>>, vector<1x768xf32>,
    %c0_63 = arith.constant 0 : index
    %c0_64 = arith.constant 0 : index
    %125 = vector.load %arg19[%c0_63, %c0_64] : memref<1x1xf32, #tpu.memory_space<vmem>>, vector<1x1xf32>
    tpu.vector_store %arg19[%c0_63, %c0_64], %40 {strides = array<i32>} : memref<1x1xf32, #tpu.memory_space<vmem>>, vector<1x1xf32>,
    %126 = tpu.iota {dimensions = array<i32: 1>} : vector<1x128xi32>
    %cst_65 = arith.constant 0.000000e+00 : f32
    %127 = vector.broadcast %cst_65 : f32 to vector<1x128xf32>
    %c0_i32_66 = arith.constant 0 : i32
    %128 = vector.broadcast %c0_i32_66 : i32 to vector<1x128xi32>
    %129 = arith.cmpi eq, %126, %128 : vector<1x128xi32>
    %130 = vector.shape_cast %33 : vector<1x1xf32> to vector<1x1xf32>
    %131 = vector.broadcast %130 : vector<1x1xf32> to vector<1x128xf32>
    %132 = arith.select %129, %131, %127 : vector<1x128xi1>, vector<1x128xf32>
    %c1_i32_67 = arith.constant 1 : i32
    %133 = vector.broadcast %c1_i32_67 : i32 to vector<1x128xi32>
    %134 = arith.cmpi eq, %126, %133 : vector<1x128xi32>
    %135 = vector.shape_cast %63 : vector<1x1xf32> to vector<1x1xf32>
    %136 = vector.broadcast %135 : vector<1x1xf32> to vector<1x128xf32>
    %137 = arith.select %134, %136, %127 : vector<1x128xi1>, vector<1x128xf32>
    %138 = arith.addf %132, %137 : vector<1x128xf32>
    %c2_i32_68 = arith.constant 2 : i32
    %139 = vector.broadcast %c2_i32_68 : i32 to vector<1x128xi32>
    %140 = arith.cmpi eq, %126, %139 : vector<1x128xi32>
    %141 = vector.shape_cast %40 : vector<1x1xf32> to vector<1x1xf32>
    %142 = vector.broadcast %141 : vector<1x1xf32> to vector<1x128xf32>
    %143 = arith.select %140, %142, %127 : vector<1x128xi1>, vector<1x128xf32>
    %144 = arith.addf %138, %143 : vector<1x128xf32>
    %c3_i32 = arith.constant 3 : i32
    %145 = vector.broadcast %c3_i32 : i32 to vector<1x128xi32>
    %146 = arith.cmpi eq, %126, %145 : vector<1x128xi32>
    %c0_69 = arith.constant 0 : index
    %c0_70 = arith.constant 0 : index
    %147 = vector.load %arg20[%c0_69, %c0_70] : memref<1x1xf32, #tpu.memory_space<vmem>>, vector<1x1xf32>
    %148 = vector.shape_cast %147 : vector<1x1xf32> to vector<1x1xf32>
    %149 = vector.broadcast %148 : vector<1x1xf32> to vector<1x128xf32>
    %150 = arith.select %146, %149, %127 : vector<1x128xi1>, vector<1x128xf32>
    %151 = arith.addf %144, %150 : vector<1x128xf32>
    %c4_i32_71 = arith.constant 4 : i32
    %152 = vector.broadcast %c4_i32_71 : i32 to vector<1x128xi32>
    %153 = arith.cmpi eq, %126, %152 : vector<1x128xi32>
    %c0_72 = arith.constant 0 : index
    %c0_73 = arith.constant 0 : index
    %154 = vector.load %arg21[%c0_72, %c0_73] : memref<1x1xf32, #tpu.memory_space<vmem>>, vector<1x1xf32>
    %155 = vector.shape_cast %154 : vector<1x1xf32> to vector<1x1xf32>
    %156 = vector.broadcast %155 : vector<1x1xf32> to vector<1x128xf32>
    %157 = arith.select %153, %156, %127 : vector<1x128xi1>, vector<1x128xf32>
    %158 = arith.addf %151, %157 : vector<1x128xf32>
    %c0_74 = arith.constant 0 : index
    %c0_75 = arith.constant 0 : index
    %159 = vector.load %arg18[%c0_74, %c0_75] : memref<1x128xf32, #tpu.memory_space<vmem>>, vector<1x128xf32>
    tpu.vector_store %arg18[%c0_74, %c0_75], %158 {strides = array<i32>} : memref<1x128xf32, #tpu.memory_space<vmem>>, vector<1x128xf32>,
    return
  }
  func.func @transform_0(%arg0: i32, %arg1: memref<8xi32, #tpu.memory_space<smem>>) -> (i32, i32) {
    %c0_i32 = arith.constant 0 : i32
    %c0_i32_0 = arith.constant 0 : i32
    %c0_i32_1 = arith.constant 0 : i32
    return %c0_i32, %c0_i32_0 : i32, i32
  }
  func.func @transform_1(%arg0: i32, %arg1: memref<8xi32, #tpu.memory_space<smem>>) -> (i32, i32) {
    %c0_i32 = arith.constant 0 : i32
    %c0_i32_0 = arith.constant 0 : i32
    %c0_i32_1 = arith.constant 0 : i32
    return %c0_i32, %c0_i32_0 : i32, i32
  }
  func.func @transform_2(%arg0: i32, %arg1: memref<8xi32, #tpu.memory_space<smem>>) -> (i32, i32) {
    %c0_i32 = arith.constant 0 : i32
    %c0_i32_0 = arith.constant 0 : i32
    %c0_i32_1 = arith.constant 0 : i32
    return %c0_i32, %c0_i32_0 : i32, i32
  }
  func.func @transform_3(%arg0: i32, %arg1: memref<8xi32, #tpu.memory_space<smem>>) -> (i32, i32) {
    %c0_i32 = arith.constant 0 : i32
    %c0_i32_0 = arith.constant 0 : i32
    %c0_i32_1 = arith.constant 0 : i32
    return %c0_i32, %c0_i32_0 : i32, i32
  }
  func.func @transform_4(%arg0: i32, %arg1: memref<8xi32, #tpu.memory_space<smem>>) -> (i32, i32) {
    %c0_i32 = arith.constant 0 : i32
    %c0_i32_0 = arith.constant 0 : i32
    %c0_i32_1 = arith.constant 0 : i32
    return %c0_i32, %c0_i32_0 : i32, i32
  }
  func.func @transform_5(%arg0: i32, %arg1: memref<8xi32, #tpu.memory_space<smem>>) -> (i32, i32) {
    %c0_i32 = arith.constant 0 : i32
    %c0_i32_0 = arith.constant 0 : i32
    %c0_i32_1 = arith.constant 0 : i32
    return %c0_i32, %c0_i32_0 : i32, i32
  }
  func.func @transform_6(%arg0: i32, %arg1: memref<8xi32, #tpu.memory_space<smem>>) -> (i32, i32) {
    %c0_i32 = arith.constant 0 : i32
    %c0_i32_0 = arith.constant 0 : i32
    %c0_i32_1 = arith.constant 0 : i32
    return %c0_i32, %c0_i32_0 : i32, i32
  }
  func.func @transform_7(%arg0: i32, %arg1: memref<8xi32, #tpu.memory_space<smem>>) -> (i32, i32) {
    %c0_i32 = arith.constant 0 : i32
    %c0_i32_0 = arith.constant 0 : i32
    %c0_i32_1 = arith.constant 0 : i32
    return %c0_i32, %c0_i32_0 : i32, i32
  }
  func.func @transform_8(%arg0: i32, %arg1: memref<8xi32, #tpu.memory_space<smem>>) -> (i32, i32) {
    %c0_i32 = arith.constant 0 : i32
    %c0_i32_0 = arith.constant 0 : i32
    %c0_i32_1 = arith.constant 0 : i32
    return %c0_i32, %c0_i32_0 : i32, i32
  }
  func.func @transform_9(%arg0: i32, %arg1: memref<8xi32, #tpu.memory_space<smem>>) -> (i32, i32) {
    %c0_i32 = arith.constant 0 : i32
    %c0_i32_0 = arith.constant 0 : i32
    %c0_i32_1 = arith.constant 0 : i32
    return %c0_i32, %c0_i32_0 : i32, i32
  }
  func.func @transform_10(%arg0: i32, %arg1: memref<8xi32, #tpu.memory_space<smem>>) -> (i32, i32, i32) {
    %c0_i32 = arith.constant 0 : i32
    %c0_i32_0 = arith.constant 0 : i32
    %c0_i32_1 = arith.constant 0 : i32
    return %arg0, %c0_i32, %c0_i32_0 : i32, i32, i32
  }
  func.func @transform_11(%arg0: i32, %arg1: memref<8xi32, #tpu.memory_space<smem>>) -> (i32, i32, i32) {
    %c0_i32 = arith.constant 0 : i32
    %c0_i32_0 = arith.constant 0 : i32
    %c0_i32_1 = arith.constant 0 : i32
    return %arg0, %c0_i32, %c0_i32_0 : i32, i32, i32
  }
  func.func @transform_12(%arg0: i32, %arg1: memref<8xi32, #tpu.memory_space<smem>>) -> (i32, i32) {
    %c0_i32 = arith.constant 0 : i32
    %c0_i32_0 = arith.constant 0 : i32
    %c0_i32_1 = arith.constant 0 : i32
    return %c0_i32, %c0_i32_0 : i32, i32
  }
  func.func @transform_13(%arg0: i32, %arg1: memref<8xi32, #tpu.memory_space<smem>>) -> (i32, i32) {
    %c0_i32 = arith.constant 0 : i32
    %c0_i32_0 = arith.constant 0 : i32
    %c0_i32_1 = arith.constant 0 : i32
    return %c0_i32, %c0_i32_0 : i32, i32
  }
  func.func @transform_14(%arg0: i32, %arg1: memref<8xi32, #tpu.memory_space<smem>>) -> (i32, i32) {
    %c0_i32 = arith.constant 0 : i32
    %c0_i32_0 = arith.constant 0 : i32
    %c0_i32_1 = arith.constant 0 : i32
    return %c0_i32, %c0_i32_0 : i32, i32
  }
  func.func @transform_15(%arg0: i32, %arg1: memref<8xi32, #tpu.memory_space<smem>>) -> (i32, i32) {
    %c0_i32 = arith.constant 0 : i32
    %c0_i32_0 = arith.constant 0 : i32
    %c0_i32_1 = arith.constant 0 : i32
    return %c0_i32, %c0_i32_0 : i32, i32
  }
  func.func @transform_16(%arg0: i32, %arg1: memref<8xi32, #tpu.memory_space<smem>>) -> (i32, i32) {
    %c0_i32 = arith.constant 0 : i32
    %c0_i32_0 = arith.constant 0 : i32
    %c0_i32_1 = arith.constant 0 : i32
    return %c0_i32, %c0_i32_0 : i32, i32
  }
}

</mosaic_0001>

<bundles_post_ra>
// kernel: run.1
= control target key start
LH: loop header
LB: loop body
LE: loop exit
PB: predicated region body
PF: predicated region fallthrough
CT: control target
= control target key end

     0   :  { %s3243_s0 = inlined_call_operand.vmem [shape: s32[8], index: 0, kind: input, shape index: {}]   ;;  %s3244_s1 = inlined_call_operand.vmem [shape: f32[8,768], index: 1, kind: input, shape index: {}]   ;;  %s3245_s2 = inlined_call_operand.vmem [shape: f32[1,768], index: 2, kind: input, shape index: {}]   ;;  %s3246_s3 = inlined_call_operand.vmem [shape: bf16[768,32], index: 3, kind: input, shape index: {}]   ;;  %s3247_s4 = inlined_call_operand.vmem [shape: f32[1,32], index: 4, kind: input, shape index: {}]   ;;  %s3248_s5 = inlined_call_operand.vmem [shape: f32[1,32], index: 5, kind: input, shape index: {}]   ;;  %s3249_s6 = inlined_call_operand.vmem [shape: bf16[16,768], index: 6, kind: input, shape index: {}]   ;;  %s3250_s7 = inlined_call_operand.vmem [shape: f32[1,768], index: 7, kind: input, shape index: {}]   ;;  %s3251_s8 = inlined_call_operand.vmem [shape: f32[1,768], index: 8, kind: input, shape index: {}]   ;;  %s3252_s9 = inlined_call_operand.vmem [shape: f32[1,768], index: 9, kind: input, shape index: {}]   ;;  %s3253_s10 = inlined_call_operand.vmem [shape: f32[1,128], index: 10, kind: input, shape index: {}]   ;;  %s3254_s11 = inlined_call_operand.vmem [shape: f32[8,8,16], index: 11, kind: input, shape index: {}]   ;;  %s3255_s12 = inlined_call_operand.vmem [shape: f32[8,8,1], index: 12, kind: input, shape index: {}]   ;;  %s3256_s13 = inlined_call_operand.hbm [shape: f32[8,768], index: 13, kind: output, shape index: {0}]   ;;  %s3257_s14 = inlined_call_operand.hbm [shape: f32[1,768], index: 14, kind: output, shape index: {1}]   ;;  %s3258_s15 = inlined_call_operand.hbm [shape: f32[1,768], index: 15, kind: output, shape index: {2}]   ;;  %s3259_s16 = inlined_call_operand.hbm [shape: f32[1,768], index: 16, kind: output, shape index: {3}]   ;;  %s3260_s17 = inlined_call_operand.hbm [shape: f32[1,128], index: 17, kind: output, shape index: {4}]  }
   0x1   :  { %3262 = sst [smem:[#allocation19_spill]] %s3243_s0 }
   0x2   :  { %3263 = sst [smem:[#allocation20_spill]] %s3244_s1  ;;  %s3265_s26 = sld [smem:[#allocation19_spill]] }
   0x3   :  { %3264 = sst [smem:[#allocation21_spill]] %s3250_s7 }
   0x8   :  { %s23_s7 = sshll.u32 %s3265_s26, 4  ;;  %s24_s7 = int_to_ptr.vmem [resolvable:$true] %s23_s7 }
   0x9   :  { %s2267_s27 = scalar_lea.vmem %s24_s7, 16  ;;  %p2272_p1 = scmp.lt.s32.totalorder %s24_s7, %s24_s7 }
   0xa   :  { %p2268_p0 = scmp.ne.s32.totalorder %s24_s7, %s2267_s27  ;;  %p2273_p2 = scmp.lt.s32.totalorder %s2267_s27, %s2267_s27 }
   0xc   :  { %p2274_p3 = por %p2273_p2, %p2272_p1 }
   0xe   :  { %p2275_p4 = pnand %p2274_p3, %p2268_p0 }
  0x10   :  { %2278 = shalt.err (!%p2275_p4)  }
  0x11   :  { %s2431_s28 = smov [#allocation6]  }
  0x12   :  { %26 = dma.vmem_to_smem %s24_s7, 16, %s2431_s28, [#allocation5] }
  0x13   :  { %2413 = dma.done.wait [#allocation5], 16 }
  0x14   :  { %2414 = vsyncadd [#allocation5], 4294967280 }
  0x15   :  { %28 = sfence }
  0x16   :  { %29 = vsyncpa [#allocation8], 0 }
  0x17   :  { %30 = vsyncpa [#allocation10], 0 }
  0x18   :  { %31 = vsyncpa [#allocation13], 0  ;;  %s2535_s29 = smov 0  }
  0x19 LB: > { %s2541_s0 = sadd.s32 4294967295, %s2429_s29   ;;  %p2001_p5 = scmp.ge.s32.totalorder %s2429_s29, 1  ;;  %s2429_s29 = sphi %s2535_s29, %s37_s29  }
  0x1a   : > { %p464_p6 = scmp.lt.s32.totalorder %s2429_s29, 9 }
  0x1c   : > { %p465_p7 = pnand %p2001_p5, %p464_p6 }
  0x1d   : > { %p512_p8 = scmp.lt.s32.totalorder (!%p465_p7), %s2541_s0, 7  ;;  %p2004_p9 = scmp.ne.s32.totalorder (!%p465_p7), %s2541_s0, 0 }
  0x1e   : > { %468 = sbr.rel (%p465_p7) target bundleno = 824 (0x338), region = 68 }
  0x25   : > { %s513_s7 = scalar_select %p512_p8, %s2541_s0, 7 }
  0x26   : > { %524 = sbr.rel (%p2004_p9) target bundleno = 159 (0x9f), region = 72  ;;  %v2005_v0 = vld [vmem:[%s3253_s10] ss:$0 sm:$0xff] (!%p2004_p9)  ;;  %v538_v2 = vlaneseq (!%p2004_p9)  ;;  %s2432_s27 = smov (!%p2004_p9), 127   ;;  %vm546_vm0 = vcmask (!%p2004_p9), 0  }
  0x27   : > { %s2002_s30 = sshll.u32 %s513_s7, 3  ;;  %v545_v1 = vld [vmem:[%s3253_s10] sm:$0x1] (!%p2004_p9)  ;;  %554 = vrot.lane.b32.xlu0 (!%p2004_p9), %v2005_v0, %s2432_s27  ;;  %s3266_s18 = sld [smem:[#allocation20_spill]] (!%p2004_p9) }
  0x28   : > { %s2550_s1 = scalar_lea.vmem %s3254_s11, %s2002_s30  ;;  %s2555_s22 = scalar_lea.vmem %s3255_s12, %s2002_s30  ;;  %547 = vst.msk [vmem:[#allocation2] sm:$0x1] (!%p2004_p9), %vm546_vm0, %v545_v1  ;;  %vm540_vm1 = vcmp.lt.s32.totalorder (!%p2004_p9), %v538_v2, 768  ;;  %v537_v9 = vld [vmem:[%s3251_s8] sm:$0x3f] (!%p2004_p9) }
  0x29   : > { %v543_v10 = vld [vmem:[%s3252_s9] sm:$0x3f] (!%p2004_p9)  ;;  %542 = vst.msk [vmem:[#allocation12] sm:$0x3f] (!%p2004_p9), %vm540_vm1, %v537_v9  ;;  %s2433_s21 = smov (!%p2004_p9), 126  }
  0x2a   : > { %544 = vst.msk [vmem:[#allocation11] sm:$0x3f] (!%p2004_p9), %vm540_vm1, %v543_v10 }
  0x2b   : > { %564 = vrot.lane.b32.xlu0 (!%p2004_p9), %v2005_v0, %s2433_s21 }
  0x2d   : > { %v525_v3 = vld [vmem:[%s3266_s18] sm:$0xff]  ;;  %v526_v4 = vld [vmem:[%s3266_s18 + $0x8] sm:$0xff]  ;;  %v527_v5 = vld [vmem:[%s3266_s18 + $0x10] sm:$0xff] }
  0x2e   : > { %v528_v6 = vld [vmem:[%s3266_s18 + $0x18] sm:$0xff]  ;;  %v529_v7 = vld [vmem:[%s3266_s18 + $0x20] sm:$0xff]  ;;  %v530_v8 = vld [vmem:[%s3266_s18 + $0x28] sm:$0xff]  ;;  %531 = vst [vmem:[#allocation7] sm:$0xff] %v525_v3 }
  0x2f   : > { %532 = vst [vmem:[#allocation7 + $0x8] sm:$0xff] %v526_v4  ;;  %533 = vst [vmem:[#allocation7 + $0x10] sm:$0xff] %v527_v5 }
  0x30   : > { %534 = vst [vmem:[#allocation7 + $0x18] sm:$0xff] %v528_v6  ;;  %535 = vst [vmem:[#allocation7 + $0x20] sm:$0xff] %v529_v7 }
  0x31   : > { %536 = vst [vmem:[#allocation7 + $0x28] sm:$0xff] %v530_v8 }
  0x99   : > { %v555_v11 = vpop.permute.xlu0 %554 }
  0x9a   : > { %557 = vst.msk [vmem:[#allocation3] sm:$0x1] %vm546_vm0, %v555_v11 }
  0x9d   : > { %v565_v12 = vpop.permute.xlu0 %564 }
  0x9e   : > { %567 = vst.msk [vmem:[#allocation4] sm:$0x1] %vm546_vm0, %v565_v12 }
  0x9f PF: > { %v2204_v13 = vld [vmem:[%s3246_s3 + $0x40] sm:$0xff]   ;;  %v2208_v17 = vld [vmem:[%s3246_s3 + $0x48] sm:$0xff]   ;;  %v2212_v21 = vld [vmem:[%s3246_s3 + $0x50] sm:$0xff]   ;;  %v576_v32 = vlaneseq  ;;  %vm1456_vm2 = vcmask 130048   ;;  %vm1137_vm3 = vcmask 261120   ;;  %vm1199_vm7 = vcmask 7168  }
  0xa0   : > { %v2205_v14 = vld [vmem:[%s3246_s3] sm:$0xff]   ;;  %2087 = vmatprep.subr.bf16.mxu0 %v2204_v13  ;;  %v2209_v18 = vld [vmem:[%s3246_s3 + $0x8] sm:$0xff]   ;;  %v2213_v22 = vld [vmem:[%s3246_s3 + $0x10] sm:$0xff]   ;;  %s2851_s26 = sld [smem:[#allocation6 + %s2541_s0]]  ;;  %vm1647_vm8 = vcmask 0   ;;  %p2173_p11 = scmp.eq.s32.totalorder %s2541_s0, 7 }
  0xa1   : > { %v2206_v15 = vld [vmem:[%s3246_s3 + $0xc0] sm:$0xff]   ;;  %2088 = vmatpush3.bf16.msra.mxu0 %v2205_v14  ;;  %v2210_v19 = vld [vmem:[%s3246_s3 + $0xc8] sm:$0xff]   ;;  %v2214_v23 = vld [vmem:[%s3246_s3 + $0xd0] sm:$0xff]   ;;  %v2661_v37 = vshrl.u32 %v576_v32, 7  ;;  %s2438_s7 = smov [#allocation11]  }
  0xa2   : > { %v2207_v16 = vld [vmem:[%s3246_s3 + $0x80] sm:$0xff]   ;;  %2109 = vmatprep.subr.bf16.mxu1 %v2206_v15  ;;  %2089 = vmatprep.subr.bf16.mxu0 %v2208_v17  ;;  %v2211_v20 = vld [vmem:[%s3246_s3 + $0x88] sm:$0xff]   ;;  %v2215_v24 = vld [vmem:[%s3246_s3 + $0x90] sm:$0xff]  }
  0xa3   : > { %2110 = vmatpush3.bf16.msra.mxu1 %v2207_v16  ;;  %v2216_v25 = vld [vmem:[%s3246_s3 + $0x58] sm:$0xff]   ;;  %v2220_v29 = vld [vmem:[%s3246_s3 + $0x60] sm:$0xff]   ;;  %v2224_v34 = vld [vmem:[%s3246_s3 + $0x68] sm:$0xff]   ;;  %v2676_v42 = vsub.s32 0, %v2661_v37  ;;  %v2682_v44 = vsub.s32 1, %v2661_v37  ;;  %v2688_v46 = vsub.s32 3, %v2661_v37 }
  0xa4   : > { %2111 = vmatprep.subr.bf16.mxu1 %v2210_v19  ;;  %v2217_v26 = vld [vmem:[%s3246_s3 + $0x18] sm:$0xff]   ;;  %v2221_v30 = vld [vmem:[%s3246_s3 + $0x20] sm:$0xff]   ;;  %v2225_v35 = vld [vmem:[%s3246_s3 + $0x28] sm:$0xff]   ;;  %v2694_v48 = vsub.s32 2, %v2661_v37  ;;  %v2749_v9 = vsub.s32 5, %v2661_v37  ;;  %vm1151_vm4 = vcmp.lt.s32.totalorder %v2661_v37, 4 }
  0xa5   : > { %2090 = vmatpush3.bf16.msra.mxu0 %v2209_v18  ;;  %v2218_v27 = vld [vmem:[%s3246_s3 + $0xd8] sm:$0xff]   ;;  %v2222_v31 = vld [vmem:[%s3246_s3 + $0xe0] sm:$0xff]   ;;  %v2226_v36 = vld [vmem:[%s3246_s3 + $0xe8] sm:$0xff]  }
  0xa6   : > { %2091 = vmatprep.subr.bf16.mxu0 %v2212_v21  ;;  %v2219_v28 = vld [vmem:[%s3246_s3 + $0x98] sm:$0xff]   ;;  %v2223_v33 = vld [vmem:[%s3246_s3 + $0xa0] sm:$0xff]   ;;  %v2227_v38 = vld [vmem:[%s3246_s3 + $0xa8] sm:$0xff]   ;;  %p1737_p10 = scmp.ge.s32.totalorder %s2851_s26, 1 }
  0xa7   : > { %2112 = vmatpush3.bf16.msra.mxu1 %v2211_v20  ;;  %v2228_v39 = vld [vmem:[%s3246_s3 + $0x70] sm:$0xff]   ;;  %v2232_v45 = vld [vmem:[%s3246_s3 + $0x78] sm:$0xff]   ;;  %v574_v51 = vld [vmem:[%s3245_s2] sm:$0x3f]  ;;  %v2777_v20 = vsub.s32 4, %v2661_v37 }
  0xa8   : > { %2113 = vmatprep.subr.bf16.mxu1 %v2214_v23  ;;  %v2229_v40 = vld [vmem:[%s3246_s3 + $0x30] sm:$0xff]   ;;  %v2233_v47 = vld [vmem:[%s3246_s3 + $0x38] sm:$0xff]   ;;  %v2708_v53 = vrot.slane %v574_v51, %v2682_v44  ;;  %v2710_v54 = vld [vmem:[#allocation7] sm:$0xff]  ;;  %v2713_v55 = vrot.slane %v574_v51, %v2676_v42  ;;  %v2716_v56 = vrot.slane %v574_v51, %v2688_v46  ;;  %v2722_v58 = vrot.slane %v574_v51, %v2694_v48  ;;  %s1738_s27 = scalar_select %p1737_p10, 1, 0 }
  0xa9   : > { %2092 = vmatpush3.bf16.msra.mxu0 %v2213_v22  ;;  %v2230_v41 = vld [vmem:[%s3246_s3 + $0xf0] sm:$0xff]   ;;  %v2234_v49 = vld [vmem:[%s3246_s3 + $0xf8] sm:$0xff]   ;;  %v2236_v57 = vld [vmem:[%s3246_s3 + $0x140] sm:$0xff]   ;;  %v2758_v12 = vrot.slane %v574_v51, %v2749_v9  ;;  %v2786_v23 = vrot.slane %v574_v51, %v2777_v20 }
  0xaa   : > { %2093 = vmatprep.subr.bf16.mxu0 %v2216_v25  ;;  %v2231_v43 = vld [vmem:[%s3246_s3 + $0xb0] sm:$0xff]   ;;  %v2235_v52 = vld [vmem:[%s3246_s3 + $0xb8] sm:$0xff]   ;;  %v606_v60 = vadd.f32 %v2713_v55, %v2710_v54  ;;  %v2237_v2 = vld [vmem:[%s3246_s3 + $0x100] sm:$0xff]  }
  0xab   : > { %2114 = vmatpush3.bf16.msra.mxu1 %v2215_v24  ;;  %v2699_v50 = vld [vmem:[#allocation7 + $0x8] sm:$0xff]  ;;  %v2728_v61 = vld [vmem:[#allocation7 + $0x18] sm:$0xff]  ;;  %v2732_v63 = vld [vmem:[#allocation7 + $0x10] sm:$0xff] }
  0xac   : > { %2115 = vmatprep.subr.bf16.mxu1 %v2218_v27  ;;  %v607_v59 = vadd.f32 %v2708_v53, %v2699_v50  ;;  %v609_v62 = vadd.f32 %v2716_v56, %v2728_v61  ;;  %v612_v1 = vpack.c.bf16 %v606_v60, %v606_v60  ;;  %v608_v3 = vadd.f32 %v2722_v58, %v2732_v63  ;;  %v2238_v5 = vld [vmem:[%s3246_s3 + $0x148] sm:$0xff]   ;;  %v2240_v8 = vld [vmem:[%s3246_s3 + $0x150] sm:$0xff]   ;;  %v2242_v11 = vld [vmem:[%s3246_s3 + $0x158] sm:$0xff]  }
  0xad   : > { %2094 = vmatpush3.bf16.msra.mxu0 %v2217_v26  ;;  %v2239_v7 = vld [vmem:[%s3246_s3 + $0x108] sm:$0xff]   ;;  %v2241_v10 = vld [vmem:[%s3246_s3 + $0x110] sm:$0xff]   ;;  %v2243_v13 = vld [vmem:[%s3246_s3 + $0x118] sm:$0xff]  }
  0xae   : > { %2095 = vmatprep.subr.bf16.mxu0 %v2220_v29  ;;  %v613_v0 = vpack.c.bf16 %v607_v59, %v607_v59  ;;  %v615_v4 = vpack.c.bf16 %v609_v62, %v609_v62  ;;  %v614_v6 = vpack.c.bf16 %v608_v3, %v608_v3  ;;  %v2244_v14 = vld [vmem:[%s3246_s3 + $0x160] sm:$0xff]   ;;  %v2766_v15 = vld [vmem:[#allocation7 + $0x28] sm:$0xff]  ;;  %v2250_v26 = vld [vmem:[%s3246_s3 + $0x178] sm:$0xff]  }
  0xaf   : > { %2116 = vmatpush3.bf16.msra.mxu1 %v2219_v28  ;;  %v611_v16 = vadd.f32 %v2758_v12, %v2766_v15  ;;  %v2245_v17 = vld [vmem:[%s3246_s3 + $0x120] sm:$0xff]   ;;  %v2246_v19 = vld [vmem:[%s3246_s3 + $0x168] sm:$0xff]   ;;  %v2248_v22 = vld [vmem:[%s3246_s3 + $0x170] sm:$0xff]  }
  0xb0   : > { %2117 = vmatprep.subr.bf16.mxu1 %v2222_v31  ;;  %1041 = vmatprep.mubr.bf16.mxu0 %v613_v0  ;;  %v2247_v21 = vld [vmem:[%s3246_s3 + $0x128] sm:$0xff]   ;;  %v2249_v24 = vld [vmem:[%s3246_s3 + $0x130] sm:$0xff]   ;;  %v2251_v28 = vld [vmem:[%s3246_s3 + $0x138] sm:$0xff]  }
  0xb1   : > { %2096 = vmatpush3.bf16.msra.mxu0 %v2221_v30  ;;  %1081 = vmatprep.mubr.bf16.mxu1 %v615_v4  ;;  %v617_v18 = vpack.c.bf16 %v611_v16, %v611_v16  ;;  %v2791_v25 = vld [vmem:[#allocation7 + $0x20] sm:$0xff] }
  0xb2   : > { %2097 = vmatprep.subr.bf16.mxu0 %v2224_v34  ;;  %v610_v27 = vadd.f32 %v2786_v23, %v2791_v25  ;;  %v2252_v30 = vld [vmem:[%s3249_s6] ss:$24 sps:$4 sm:$0xff]   ;;  %v2254_v31 = vld [vmem:[%s3249_s6 + $0x4] ss:$24 sps:$4 sm:$0xff]   ;;  %v2434_v34 = vmov 0  }
  0xb3   : > { %2118 = vmatpush3.bf16.msra.mxu1 %v2223_v33  ;;  %v1386_v33 = vld [vmem:[%s2550_s1] sm:$0xff]  ;;  %2202 = vset.pattern.permute.xlu1 %v2434_v34  ;;  %s1883_s1 = sshll.u32 %s2438_s7, 4  ;;  %s2972_s1 = int_to_ptr.vmem [resolvable:$true] %s1883_s1 }
  0xb4   : > { %2119 = vmatprep.subr.bf16.mxu1 %v2226_v36  ;;  %v616_v29 = vpack.c.bf16 %v610_v27, %v610_v27  ;;  %v1387_v36 = vpack.c.bf16 %v1386_v33, %v1386_v33  ;;  %2203 = vset.pattern.permute.xlu0 %v2434_v34 }
  0xb5   : > { %2098 = vmatpush3.bf16.msra.mxu0 %v2225_v35  ;;  %v2257_v35 = vld [vmem:[%s3249_s6 + $0xc] ss:$24 sps:$4 sm:$0xff]  }
  0xb6   : > { %2099 = vmatprep.subr.bf16.mxu0 %v2228_v39  ;;  %v2260_v39 = vld [vmem:[%s3249_s6 + $0x14] ss:$24 sps:$4 sm:$0xff]  }
  0xb7   : > { %2120 = vmatpush3.bf16.msra.mxu1 %v2227_v38  ;;  %v2255_v38 = vld [vmem:[%s3249_s6 + $0x8] ss:$24 sps:$4 sm:$0xff]  }
  0xb8   : > { %2121 = vmatprep.subr.bf16.mxu1 %v2230_v41 }
  0xb9   : > { %2100 = vmatpush3.bf16.msra.mxu0 %v2229_v40  ;;  %v2258_v40 = vld [vmem:[%s3249_s6 + $0x10] ss:$24 sps:$4 sm:$0xff]  }
  0xba   : > { %2101 = vmatprep.subr.bf16.mxu0 %v2232_v45 }
  0xbb   : > { %2122 = vmatpush3.bf16.msra.mxu1 %v2231_v43  ;;  %v2007_v43 = vld [vmem:[%s3247_s4] ss:$0 sm:$0xff] }
  0xbc   : > { %2123 = vmatprep.subr.bf16.mxu1 %v2234_v49 }
  0xbd   : > { %2102 = vmatpush3.bf16.msra.mxu0 %v2233_v47 }
  0xbe   : > { %2131 = vmatprep.subr.bf16.mxu0 %v2236_v57 }
  0xbf   : > { %2124 = vmatpush3.bf16.msra.mxu1 %v2235_v52 }
  0xc0   : > { %1042 = vmatmul.mubr.bf16.vlgmr.msra.gmra.mrb[0].mxu0 %v612_v1  ;;  %1460 = vmatprep.subr.bf16.mxu1 %v2254_v31 }
  0xc1   : > { %2132 = vmatpush3.bf16.msra.mxu0 %v2237_v2  ;;  %1121 = vmatprep.mubr.bf16.mxu0 %v617_v18 }
  0xc2   : > { %1082 = vmatmul.mubr.bf16.vlgmr.msra.gmra.mrb[0].mxu1 %v614_v6  ;;  %2133 = vmatprep.subr.bf16.mxu0 %v2238_v5 }
  0xc3   : > { %1492 = vmatprep.mubr.bf16.mxu1 %v2434_v34  ;;  %1461 = vmatpush1.bf16.msra.mxu1 %v2252_v30 }
  0xc4   : > { %1501 = vmatprep.subr.bf16.mxu1 %v2257_v35 }
  0xc5   : > { %2134 = vmatpush3.bf16.msra.mxu0 %v2239_v7 }
  0xc6   : > { %2135 = vmatprep.subr.bf16.mxu0 %v2240_v8  ;;  %v2056_v8 = vld [vmem:[%s3248_s5] ss:$0 sm:$0xff] }
  0xc9   : > { %2136 = vmatpush3.bf16.msra.mxu0 %v2241_v10 }
  0xca   : > { %2137 = vmatprep.subr.bf16.mxu0 %v2242_v11  ;;  %2066 = vmatmul.mubr.msk.bf16.vlgmr.msra.gmra.mrb[4].mxu1 %vm1456_vm2, %v1387_v36 }
  0xcb   : > { %1502 = vmatpush1.bf16.msra.mxu1 %v2255_v38  ;;  %1533 = vmatprep.mubr.bf16.mxu1 %v2434_v34 }
  0xcc   : > { %1542 = vmatprep.subr.bf16.mxu1 %v2260_v39 }
  0xcd   : > { %2138 = vmatpush3.bf16.msra.mxu0 %v2243_v13 }
  0xce   : > { %2139 = vmatprep.subr.bf16.mxu0 %v2244_v14 }
  0xd1   : > { %2140 = vmatpush3.bf16.msra.mxu0 %v2245_v17 }
  0xd2   : > { %2141 = vmatprep.subr.bf16.mxu0 %v2246_v19  ;;  %2067 = vmatmul.mubr.msk.bf16.vlgmr.msra.gmra.mrb[8].mxu1 %vm1456_vm2, %v1387_v36 }
  0xd3   : > { %1543 = vmatpush1.bf16.msra.mxu1 %v2258_v40  ;;  %1574 = vmatprep.mubr.bf16.mxu1 %v2434_v34 }
  0xd5   : > { %2142 = vmatpush3.bf16.msra.mxu0 %v2247_v21  ;;  %v2835_v21 = vld [vmem:[#allocation2] sm:$0x1] }
  0xd6   : > { %2143 = vmatprep.subr.bf16.mxu0 %v2248_v22  ;;  %v2838_v22 = vcvt.s32.f32 %v2661_v37  ;;  %vm1214_vm10 = vcmp.lt.f32.partialorder %v2835_v21, 0.0 }
  0xd9   : > { %2144 = vmatpush3.bf16.msra.mxu0 %v2249_v24  ;;  %v1192_v24 = vrot.slane %v2835_v21, %v2676_v42 }
  0xda   : > { %2145 = vmatprep.subr.bf16.mxu0 %v2250_v26  ;;  %2068 = vmatmul.mubr.msk.bf16.vlgmr.msra.gmra.mrb[12].mxu1 %vm1456_vm2, %v1387_v36  ;;  %v2435_v26 = vmov 0.0  }
  0xdb   : > { %vm1194_vm5 = vcmp.eq.f32.partialorder %v2838_v22, %v1192_v24  ;;  %v2058_v27 = vsel %vm1151_vm4, 1.0, %v2435_v26 }
  0xdc   : > { %vm1195_vm6 = vmand %vm1194_vm5, %vm1151_vm4  ;;  %vm2963_vm5 = vcmp.lt.s32.totalorder %v576_v32, 768 }
  0xdd   : > { %2146 = vmatpush3.bf16.msra.mxu0 %v2251_v28  ;;  %v2059_v28 = vsel %vm1195_vm6, 1.0, %v2435_v26 }
  0xe0   : > { %1122 = vmatmul.mubr.bf16.vlgmr.msra.gmra.mrb[4].mxu0 %v616_v29 }
 0x193   : > { %v2103_v41 = vpop.f32.mrb[0].mxu0 }
 0x194   : > { %v2104_v45 = vpop.f32.mrb[1].mxu0 }
 0x195   : > { %v2125_v47 = vpop.f32.mrb[0].mxu1  ;;  %v2105_v49 = vadd.f32 %v2104_v45, %v2103_v41  ;;  %v2106_v51 = vpop.f32.mrb[2].mxu0 }
 0x196   : > { %v2126_v52 = vpop.f32.mrb[1].mxu1  ;;  %v2107_v57 = vpop.f32.mrb[3].mxu0 }
 0x197   : > { %v2127_v59 = vadd.f32 %v2126_v52, %v2125_v47  ;;  %v2128_v60 = vpop.f32.mrb[2].mxu1  ;;  %v1044_v62 = vadd.f32 %v2105_v49, %v2007_v43 }
 0x198   : > { %v2129_v0 = vpop.f32.mrb[3].mxu1 }
 0x199   : > { %v1084_v1 = vadd.f32 %v2127_v59, %v1044_v62 }
 0x19d   : > { %v2831_v16 = vpop.f32.mrb[4].mxu1 }
 0x19e   : > { %v2833_v17 = vpop.f32.mrb[5].mxu1 }
 0x19f   : > { %v1498_v18 = vpop.f32.mrb[6].mxu1 }
 0x1a0   : > { %v1499_v19 = vpop.f32.mrb[7].mxu1  ;;  %v1645_v18 = vld [vmem:[#allocation4] sm:$0x1] }
 0x1b3   : > { %v2147_v2 = vpop.f32.mrb[4].mxu0 }
 0x1b4   : > { %v2148_v3 = vpop.f32.mrb[5].mxu0 }
 0x1b5   : > { %v2149_v4 = vadd.f32 %v2148_v3, %v2147_v2  ;;  %v2150_v5 = vpop.f32.mrb[6].mxu0 }
 0x1b6   : > { %v2151_v6 = vpop.f32.mrb[7].mxu0  ;;  %v1739_v5 = vstv %s1738_s27 }
 0x1b7   : > { %v1124_v7 = vadd.f32 %v2149_v4, %v1084_v1  ;;  %vm2856_vm9 = vcmp.eq.s32.totalorder %v1739_v5, 1 }
 0x1b9   : > { %v1141_v10 = vmul.f32 %v1124_v7, %v1124_v7  ;;  %v1136_v13 = vmul.f32 %v2056_v8, %v1124_v7 }
 0x1bb   : > { %v1142_v11 = vsel %vm1137_vm3, %v1141_v10, 0.0  ;;  %v1138_v14 = vsel %vm1137_vm3, %v1136_v13, 0.0  ;;  %v1317_v10 = vld [vmem:[#allocation3] sm:$0x1] }
 0x1bc   : > { %1143 = vadd.xlane.f32.xlu0 %v1142_v11 }
 0x1c0   : > { %1139 = vadd.xlane.f32.xlu0 %v1138_v14 }
 0x249   : > { %v1144_v29 = vpop.xlane.xlu0 %1143 }
 0x24a   : > { %v1145_v30 = vmax.f32 %v1144_v29, 1e-16  ;;  %v1174_v31 = vmul.f32 %v2058_v27, %v1144_v29  ;;  %v1198_v33 = vmul.f32 %v2059_v28, %v1144_v29 }
 0x24c   : > { %2261 = vrsqrt.f32 %v1145_v30  ;;  %v1175_v35 = vrot.slane %v1174_v31, 4  ;;  %v1200_v36 = vsel %vm1199_vm7, %v1198_v33, 0.0 }
 0x24d   : > { %v1201_v38 = vrot.slane %v1200_v36, 4  ;;  %v1140_v59 = vpop.xlane.xlu0 %1139 }
 0x24e   : > { %v1176_v39 = vadd.f32 %v1175_v35, %v1174_v31 }
 0x24f   : > { %v1202_v40 = vadd.f32 %v1201_v38, %v1200_v36 }
 0x250   : > { %v1177_v41 = vrot.slane %v1176_v39, 2 }
 0x251   : > { %v1203_v43 = vrot.slane %v1202_v40, 2 }
 0x252   : > { %v1178_v45 = vadd.f32 %v1177_v41, %v1176_v39  ;;  %v1583_v41 = vld [vmem:[%s2555_s22] sm:$0xff]  ;;  %s2437_s22 = smov [#allocation9]  }
 0x253   : > { %v1204_v47 = vadd.f32 %v1203_v43, %v1202_v40  ;;  %v2881_v43 = vpop.f32.mrb[8].mxu1  ;;  %s1872_s28 = sshll.u32 %s2437_s22, 4  ;;  %s1873_s28 = int_to_ptr.vmem [resolvable:$true] %s1872_s28 }
 0x254   : > { %v1179_v49 = vrot.slane %v1178_v45, 1  ;;  %s2279_s30 = scalar_lea.vmem %s1873_s28, 96  ;;  %p2286_p1 = scmp.lt.s32.totalorder %s1873_s28, %s1873_s28 }
 0x255   : > { %v1205_v51 = vrot.slane %v1204_v47, 1  ;;  %p2280_p12 = scmp.ne.s32.totalorder %s1873_s28, %s2279_s30  ;;  %p2287_p2 = scmp.lt.s32.totalorder %s2279_s30, %s2279_s30 }
 0x256   : > { %v2262_v52 = vpop.eup %2261  ;;  %v1180_v57 = vadd.f32 %v1179_v49, %v1178_v45  ;;  %v1584_v49 = vmul.f32 0.001, %v1583_v41 }
 0x257   : > { %v1206_v60 = vadd.f32 %v1205_v51, %v1204_v47  ;;  %v1147_v62 = vmul.f32 %v2262_v52, %v1140_v59  ;;  %p2281_p13 = pnand %p2280_p12, %p2173_p11  ;;  %p2288_p3 = por %p2287_p2, %p2286_p1 }
 0x258   : > { %2263 = vrsqrt.f32 %v1180_v57  ;;  %vm1183_vm11 = vcmp.eq.f32.partialorder %v1180_v57, inf  ;;  %v1186_v19 = vand.u32 2147483648, %v1180_v57  ;;  %vm1185_vm12 = vcmp.eq.f32.partialorder %v1180_v57, 0.0 }
 0x259   : > { %v1152_v0 = vsel %vm1151_vm4, %v1147_v62, -1e+30  ;;  %2265 = vrsqrt.f32 %v1206_v60  ;;  %vm1209_vm13 = vcmp.eq.f32.partialorder %v1206_v60, inf  ;;  %v1212_v28 = vand.u32 2147483648, %v1206_v60  ;;  %p2282_p0 = pneg %p2281_p13 }
 0x25a   : > { %v1153_v1 = vrot.slane %v1152_v0, 4  ;;  %vm1211_vm2 = vcmp.eq.f32.partialorder %v1206_v60, 0.0 }
 0x25b   : > { %p2289_p4 = pnand %p2288_p3, %p2282_p0 }
 0x25c   : > { %v1154_v2 = vmax.f32 %v1152_v0, %v1153_v1 }
 0x25e   : > { %v1155_v3 = vrot.slane %v1154_v2, 2 }
 0x260   : > { %v1156_v4 = vmax.f32 %v1154_v2, %v1155_v3 }
 0x262   : > { %v2264_v6 = vpop.eup %2263  ;;  %v1157_v7 = vrot.slane %v1156_v4, 1 }
 0x263   : > { %v2266_v8 = vpop.eup %2265  ;;  %v1182_v13 = vmul.f32 %v2264_v6, %v1180_v57 }
 0x264   : > { %v2861_v14 = vmax.f32 %v1156_v4, %v1157_v7  ;;  %v1208_v24 = vmul.f32 %v2266_v8, %v1206_v60  ;;  %v2436_v4 = vmov 1966171168  }
 0x265   : > { %v1184_v27 = vsel %vm1183_vm11, %v1180_v57, %v1182_v13  ;;  %v2884_v57 = vpop.f32.mrb[9].mxu1  ;;  %v1274_v5 = vunpack.c.l.s4 %v2436_v4 }
 0x266   : > { %vm1159_vm14 = vcmp.eq.f32.partialorder %v1152_v0, %v2861_v14  ;;  %vm1319_vm15 = vcmp.gt.f32.partialorder %v2861_v14, %v1317_v10  ;;  %vm1644_vm0 = vcmp.gt.f32.partialorder %v2861_v14, -0.5  ;;  %v1187_v29 = vsel %vm1185_vm12, %v1186_v19, %v1184_v27  ;;  %v1539_v59 = vpop.f32.mrb[10].mxu1 }
 0x267   : > { %vm1160_vm1 = vmand %vm1159_vm14, %vm1151_vm4  ;;  %v1320_v30 = vsel %vm1319_vm15, 1, %v2434_v34  ;;  %v1646_v31 = vsel %vm1644_vm0, %v2861_v14, %v1645_v18  ;;  %v1210_v33 = vsel %vm1209_vm13, %v1206_v60, %v1208_v24  ;;  %v1540_v21 = vpop.f32.mrb[11].mxu1 }
 0x268   : > { %v1161_v35 = vsel %vm1160_vm1, %v2838_v22, 8.0  ;;  %1648 = vst.msk [vmem:[#allocation4] sm:$0x1] %vm1647_vm8, %v1646_v31  ;;  %vm1741_vm3 = vmand %vm1319_vm15, %vm2856_vm9  ;;  %1322 = vperm.xlu1 %2202, %v1320_v30   ;;  %v1213_v36 = vsel %vm1211_vm2, %v1212_v28, %v1210_v33  ;;  %v2886_v62 = vpop.f32.mrb[12].mxu1 }
 0x269   : > { %v1162_v38 = vrot.slane %v1161_v35, 4  ;;  %v1742_v39 = vsel %vm1741_vm3, %v2861_v14, %v1317_v10  ;;  %v1215_v40 = vsel %vm1214_vm10, %v1187_v29, %v1213_v36  ;;  %v1744_v47 = vsel %vm1741_vm3, 1, %v2434_v34  ;;  %v2890_v2 = vpop.f32.mrb[13].mxu1 }
 0x26a   : > { %1743 = vst.msk [vmem:[#allocation3] sm:$0x1] %vm1647_vm8, %v1742_v39  ;;  %1815 = vperm.xlu0 %2203, %v1215_v40   ;;  %v1580_v3 = vpop.f32.mrb[14].mxu1  ;;  %v1275_v29 = vunpack.c.0.s8 %v1274_v5  ;;  %v1649_v39 = vld [vmem:[#allocation11] sm:$0x3f] }
 0x26b   : > { %v1163_v45 = vmin.f32 %v1161_v35, %v1162_v38  ;;  %v1581_v34 = vpop.f32.mrb[15].mxu1  ;;  %v1660_v21 = vrot.slane %v1649_v39, %v2682_v44 }
 0x26c   : > { %1746 = vperm.xlu1 %2202, %v1744_v47  }
 0x26d   : > { %v1164_v51 = vrot.slane %v1163_v45, 2 }
 0x26f   : > { %v1165_v52 = vmin.f32 %v1163_v45, %v1164_v51  ;;  %v1841_v13 = vld [vmem:[#allocation4] sm:$0x1] }
 0x270   : > { %1587 = vperm.xlu1 %2202, %v1584_v49  }
 0x271   : > { %v1166_v60 = vrot.slane %v1165_v52, 1  ;;  %v1828_v1 = vld [vmem:[#allocation3] sm:$0x1] }
 0x273   : > { %v2888_v0 = vmin.f32 %v1165_v52, %v1166_v60  ;;  %v1656_v60 = vrot.slane %v1649_v39, %v2676_v42 }
 0x274   : > { %1831 = vperm.xlu1 %2202, %v1828_v1  }
 0x275   : > { %vm1168_vm4 = vcmp.eq.f32.partialorder %v2838_v22, %v2888_v0  ;;  %1807 = vst.msk [vmem:[#allocation2] sm:$0x1] %vm1647_vm8, %v2888_v0 }
 0x276   : > { %v2057_v6 = vsel %vm1168_vm4, 1.0, %v2435_v26 }
 0x277   : > { %v1216_v7 = vmul.f32 %v2057_v6, %v2710_v54  ;;  %v1217_v8 = vmul.f32 %v2057_v6, %v2699_v50  ;;  %v1218_v10 = vmul.f32 %v2057_v6, %v2732_v63  ;;  %v1219_v11 = vmul.f32 %v2057_v6, %v2728_v61 }
 0x278   : > { %v1220_v18 = vmul.f32 %v2057_v6, %v2791_v25  ;;  %v1221_v22 = vmul.f32 %v2057_v6, %v2766_v15  ;;  %1844 = vperm.xlu1 %2202, %v1841_v13   ;;  %v2904_v15 = vsub.s32 %v1275_v29, %v2661_v37  ;;  %v1664_v37 = vrot.slane %v1649_v39, %v2694_v48 }
 0x279   : > { %v1222_v19 = vrot.slane %v1216_v7, 4  ;;  %v1228_v24 = vrot.slane %v1217_v8, 4  ;;  %v1234_v27 = vrot.slane %v1218_v10, 4  ;;  %v1240_v28 = vrot.slane %v1219_v11, 4 }
 0x27a   : > { %v1246_v26 = vrot.slane %v1220_v18, 4  ;;  %v1252_v30 = vrot.slane %v1221_v22, 4 }
 0x27b   : > { %v1223_v54 = vadd.f32 %v1222_v19, %v1216_v7  ;;  %v1229_v31 = vadd.f32 %v1228_v24, %v1217_v8  ;;  %v1235_v50 = vadd.f32 %v1234_v27, %v1218_v10  ;;  %v1241_v33 = vadd.f32 %v1240_v28, %v1219_v11 }
 0x27c   : > { %v1247_v63 = vadd.f32 %v1246_v26, %v1220_v18  ;;  %v1253_v35 = vadd.f32 %v1252_v30, %v1221_v22  ;;  %v1668_v7 = vrot.slane %v1649_v39, %v2688_v46  ;;  %v1672_v19 = vrot.slane %v1649_v39, %v2777_v20 }
 0x27d   : > { %v1224_v61 = vrot.slane %v1223_v54, 2  ;;  %v1230_v36 = vrot.slane %v1229_v31, 2  ;;  %v1236_v38 = vrot.slane %v1235_v50, 2  ;;  %v1242_v25 = vrot.slane %v1241_v33, 2 }
 0x27e   : > { %v1248_v40 = vrot.slane %v1247_v63, 2  ;;  %v1254_v41 = vrot.slane %v1253_v35, 2  ;;  %v1676_v24 = vrot.slane %v1649_v39, %v2749_v9 }
 0x27f   : > { %v1225_v45 = vadd.f32 %v1224_v61, %v1223_v54  ;;  %v1231_v47 = vadd.f32 %v1230_v36, %v1229_v31  ;;  %v1237_v49 = vadd.f32 %v1236_v38, %v1235_v50  ;;  %v1243_v51 = vadd.f32 %v1242_v25, %v1241_v33 }
 0x280   : > { %v1249_v52 = vadd.f32 %v1248_v40, %v1247_v63  ;;  %v1255_v59 = vadd.f32 %v1254_v41, %v1253_v35 }
 0x281   : > { %v1226_v1 = vrot.slane %v1225_v45, 1  ;;  %v1232_v3 = vrot.slane %v1231_v47, 1  ;;  %v1238_v34 = vrot.slane %v1237_v49, 1  ;;  %v1244_v4 = vrot.slane %v1243_v51, 1 }
 0x282   : > { %v1250_v5 = vrot.slane %v1249_v52, 1  ;;  %v1256_v6 = vrot.slane %v1255_v59, 1 }
 0x283   : > { %v2910_v8 = vadd.f32 %v1226_v1, %v1225_v45  ;;  %v2912_v10 = vadd.f32 %v1232_v3, %v1231_v47  ;;  %v2914_v11 = vadd.f32 %v1238_v34, %v1237_v49  ;;  %v2916_v13 = vadd.f32 %v1244_v4, %v1243_v51 }
 0x284   : > { %v2918_v18 = vadd.f32 %v1250_v5, %v1249_v52  ;;  %v2920_v22 = vadd.f32 %v1256_v6, %v1255_v59 }
 0x285   : > { %v1258_v27 = vadd.f32 %v2910_v8, %v2713_v55  ;;  %v1259_v28 = vadd.f32 %v2912_v10, %v2708_v53  ;;  %v1260_v29 = vadd.f32 %v2914_v11, %v2722_v58  ;;  %v1261_v26 = vadd.f32 %v2916_v13, %v2716_v56 }
 0x286   : > { %v1262_v30 = vadd.f32 %v2918_v18, %v2786_v23  ;;  %v1263_v54 = vadd.f32 %v2920_v22, %v2758_v12  ;;  %v1683_v31 = vsel %vm1644_vm0, %v2910_v8, %v1656_v60  ;;  %v1684_v53 = vsel %vm1644_vm0, %v2912_v10, %v1660_v21 }
 0x287   : > { %v1270_v55 = vcombine.low %v1258_v27, %v1259_v28  ;;  %v1271_v50 = vcombine.low %v1260_v29, %v1261_v26  ;;  %v1685_v56 = vsel %vm1644_vm0, %v2914_v11, %v1664_v37  ;;  %v1686_v58 = vsel %vm1644_vm0, %v2916_v13, %v1668_v7 }
 0x288   : > { %v1272_v23 = vcombine.low %v1262_v30, %v1263_v54  ;;  %v1687_v12 = vsel %vm1644_vm0, %v2918_v18, %v1672_v19  ;;  %v1688_v33 = vsel %vm1644_vm0, %v2920_v22, %v1676_v24  ;;  %v1695_v63 = vcombine.low %v1683_v31, %v1684_v53 }
 0x289   : > { %v1279_v35 = vrot.slane %v1270_v55, %v2904_v15  ;;  %v1286_v61 = vrot.slane %v1271_v50, %v2904_v15  ;;  %v1696_v36 = vcombine.low %v1685_v56, %v1686_v58  ;;  %v1697_v38 = vcombine.low %v1687_v12, %v1688_v33 }
 0x28a   : > { %v1293_v25 = vrot.slane %v1272_v23, %v2904_v15  ;;  %v1704_v39 = vrot.slane %v1695_v63, %v2904_v15 }
 0x28b   : > { %v1294_v40 = vcombine.low %v1279_v35, %v1286_v61  ;;  %v1711_v41 = vrot.slane %v1696_v36, %v2904_v15  ;;  %v1718_v45 = vrot.slane %v1697_v38, %v2904_v15 }
 0x28c   : > { %v1308_v49 = vrot.slane %v1293_v25, %v2904_v15 }
 0x28d   : > { %v1301_v47 = vrot.slane %v1294_v40, %v2904_v15  ;;  %v1719_v51 = vcombine.low %v1704_v39, %v1711_v41  ;;  %v1733_v21 = vrot.slane %v1718_v45, %v2904_v15 }
 0x28f   : > { %v1309_v59 = vcombine.low %v1301_v47, %v1308_v49  ;;  %v1726_v60 = vrot.slane %v1719_v51, %v2904_v15 }
 0x291   : > { %1315 = vst.msk [vmem:[#allocation9] sm:$0x3f] %vm2963_vm5, %v1309_v59  ;;  %v1734_v1 = vcombine.low %v1726_v60, %v1733_v21 }
 0x292   : > { %2292 = shalt.err (!%p2289_p4)
}
 0x293   : > { %s2293_s21 = scalar_lea.hbm %s3257_s14, 96 }
 0x294   : > { %p2294_p5 = scmp.ne.s32.totalorder %s3257_s14, %s2293_s21  ;;  %p2299_p8 = scmp.lt.u32.totalorder %s2293_s21, %s3257_s14 }
 0x296   : > { %p2295_p6 = pnand %p2294_p5, %p2173_p11 }
 0x298   : > { %p2296_p7 = pneg %p2295_p6 }
 0x29a   : > { %p2301_p9 = pnand %p2299_p8, %p2296_p7 }
 0x29c   : > { %2304 = shalt.err (!%p2301_p9)
}
 0x29d   : > { %2156 = dma.vmem_to_hbm [thread:$0]  (%p2173_p11), %s1873_s28, 96, %s3257_s14, [#allocation10]   ;;  %1736 = vst.msk [vmem:[#allocation11] sm:$0x3f] %vm2963_vm5, %v1734_v1 }
 0x29e   : > { %s2305_s30 = scalar_lea.vmem %s2972_s1, 96  ;;  %p2312_p0 = scmp.lt.s32.totalorder %s2972_s1, %s2972_s1 }
 0x29f   : > { %p2306_p10 = scmp.ne.s32.totalorder %s2972_s1, %s2305_s30  ;;  %p2313_p1 = scmp.lt.s32.totalorder %s2305_s30, %s2305_s30 }
 0x2a1   : > { %p2307_p12 = pnand %p2306_p10, %p2173_p11  ;;  %p2314_p2 = por %p2313_p1, %p2312_p0 }
 0x2a3   : > { %p2308_p13 = pneg %p2307_p12 }
 0x2a5   : > { %p2315_p3 = pnand %p2314_p2, %p2308_p13 }
 0x2a7   : > { %2318 = shalt.err (!%p2315_p3)
}
 0x2a8   : > { %s2319_s21 = scalar_lea.hbm %s3258_s15, 96 }
 0x2a9   : > { %p2320_p4 = scmp.ne.s32.totalorder %s3258_s15, %s2319_s21  ;;  %p2325_p7 = scmp.lt.u32.totalorder %s2319_s21, %s3258_s15 }
 0x2ab   : > { %p2321_p5 = pnand %p2320_p4, %p2173_p11 }
 0x2ad   : > { %p2322_p6 = pneg %p2321_p5 }
 0x2af   : > { %p2327_p8 = pnand %p2325_p7, %p2322_p6 }
 0x2b1   : > { %2330 = shalt.err (!%p2327_p8)
}
 0x2b2   : > { %2158 = dma.vmem_to_hbm [thread:$0]  (%p2173_p11), %s2972_s1, 96, %s3258_s15, [#allocation10]   ;;  %v3020_v3 = vand.u32 127, %v576_v32  ;;  %v1318_v4 = vld [vmem:[#allocation12] sm:$0x3f] }
 0x2b3   : > { %p1367_p9 = scmp.eq.s32.totalorder %s2851_s26, 2  ;;  %p1366_p10 = scmp.eq.s32.totalorder %s2851_s26, 1  ;;  %v3029_v37 = vrot.slane %v1318_v4, %v2676_v42  ;;  %v3032_v32 = vrot.slane %v1318_v4, %v2682_v44  ;;  %v3038_v29 = vrot.slane %v1318_v4, %v2694_v48  ;;  %v3041_v26 = vrot.slane %v1318_v4, %v2688_v46 }
 0x2b4   : > { %s3271_s20 = sld [smem:[#allocation21_spill]]  ;;  %vm1810_vm6 = vcmp.eq.s32.totalorder %v3020_v3, 0  ;;  %v3044_v30 = vrot.slane %v1318_v4, %v2777_v20  ;;  %vm1824_vm9 = vcmp.eq.s32.totalorder %v3020_v3, 2  ;;  %vm1812_vm10 = vcmp.eq.s32.totalorder %v3020_v3, 1  ;;  %s2439_s26 = smov [#allocation7]  }
 0x2b5   : > { %s1368_s7 = scalar_select %p1367_p9, 1, 0  ;;  %v1825_v33 = vsel %vm1824_vm9, %v2888_v0, 0.0  ;;  %vm1827_vm12 = vcmp.eq.s32.totalorder %v3020_v3, 3  ;;  %vm1840_vm13 = vcmp.eq.s32.totalorder %v3020_v3, 4 }
 0x2b6   : > { %s1377_s21 = scalar_select %p1366_p10, 1, 0 }
 0x2b7   : > { %v1369_v7 = vstv %s1368_s7  ;;  %s1861_s1 = sshll.u32 %s2439_s26, 4  ;;  %s2440_s28 = smov [#allocation12]   ;;  %s1862_s1 = int_to_ptr.vmem [resolvable:$true] %s1861_s1 }
 0x2b8   : > { %v1378_v19 = vstv %s1377_s21  ;;  %vm3050_vm7 = vcmp.eq.s32.totalorder %v1369_v7, 1  ;;  %s1894_s23 = sshll.u32 %s2440_s28, 4  ;;  %s2331_s24 = scalar_lea.vmem %s1862_s1, 768  ;;  %s1895_s23 = int_to_ptr.vmem [resolvable:$true] %s1894_s23 }
 0x2b9   : > { %vm3054_vm8 = vcmp.eq.s32.totalorder %v1378_v19, 1  ;;  %p2332_p12 = scmp.ne.s32.totalorder %s1862_s1, %s2331_s24  ;;  %p2338_p1 = scmp.lt.s32.totalorder %s1862_s1, %s1862_s1 }
 0x2ba   : > { %v1394_v34 = vld [vmem:[%s3271_s20] sm:$0x3f]  ;;  %p2339_p2 = scmp.lt.s32.totalorder %s2331_s24, %s2331_s24 }
 0x2bb   : > { %v1399_v5 = vrot.slane %v1394_v34, %v2676_v42  ;;  %v1403_v6 = vrot.slane %v1394_v34, %v2682_v44  ;;  %v1407_v24 = vrot.slane %v1394_v34, %v2694_v48  ;;  %v1411_v27 = vrot.slane %v1394_v34, %v2688_v46  ;;  %p2333_p13 = pnand %p2332_p12, %p2173_p11 }
 0x2bc   : > { %v1415_v28 = vrot.slane %v1394_v34, %v2777_v20  ;;  %v1419_v54 = vrot.slane %v1394_v34, %v2749_v9  ;;  %v3048_v44 = vrot.slane %v1318_v4, %v2749_v9  ;;  %v1811_v9 = vsel %vm1810_vm6, %v2861_v14, 0.0  ;;  %p2340_p3 = por %p2339_p2, %p2338_p1 }
 0x2bd   : > { %v1495_v46 = vadd.f32 %v2831_v16, %v1399_v5  ;;  %v1497_v20 = vadd.f32 %v2833_v17, %v1403_v6  ;;  %v1536_v50 = vadd.f32 %v2881_v43, %v1407_v24  ;;  %v1538_v58 = vadd.f32 %v2884_v57, %v1411_v27  ;;  %p2334_p0 = pneg %p2333_p13 }
 0x2be   : > { %v1577_v23 = vadd.f32 %v2886_v62, %v1415_v28  ;;  %v1579_v17 = vadd.f32 %v2890_v2, %v1419_v54 }
 0x2bf   : > { %p2341_p4 = pnand %p2340_p3, %p2334_p0 }
 0x2e7   : > { %v1323_v48 = vpop.permute.xlu1 %1322 }
 0x2e8   : > { %v1327_v55 = vrot.slane %v1323_v48, %v2676_v42 }
 0x2e9   : > { %v1816_v56 = vpop.permute.xlu0 %1815 }
 0x2ea   : > { %vm3069_vm11 = vcmp.eq.s32.totalorder %v1327_v55, 1  ;;  %v1821_v16 = vrot.slane %v1816_v56, %v2676_v42 }
 0x2eb   : > { %v1360_v14 = vsel %vm3069_vm11, %v2910_v8, %v3029_v37  ;;  %v1361_v43 = vsel %vm3069_vm11, %v2912_v10, %v3032_v32  ;;  %v1362_v57 = vsel %vm3069_vm11, %v2914_v11, %v3038_v29  ;;  %v1363_v62 = vsel %vm3069_vm11, %v2916_v13, %v3041_v26  ;;  %v1747_v0 = vpop.permute.xlu1 %1746 }
 0x2ec   : > { %v1364_v2 = vsel %vm3069_vm11, %v2918_v18, %v3044_v30  ;;  %v1365_v63 = vsel %vm3069_vm11, %v2920_v22, %v3048_v44  ;;  %v1371_v35 = vsel %vm3050_vm7, %v1360_v14, %v2910_v8  ;;  %v1372_v61 = vsel %vm3050_vm7, %v1361_v43, %v2912_v10 }
 0x2ed   : > { %v1373_v36 = vsel %vm3050_vm7, %v1362_v57, %v2914_v11  ;;  %v1374_v38 = vsel %vm3050_vm7, %v1363_v62, %v2916_v13  ;;  %v1375_v25 = vsel %vm3050_vm7, %v1364_v2, %v2918_v18  ;;  %v1376_v39 = vsel %vm3050_vm7, %v1365_v63, %v2920_v22 }
 0x2ee   : > { %v1380_v40 = vsel %vm3054_vm8, 0.0, %v1371_v35  ;;  %v1381_v41 = vsel %vm3054_vm8, 0.0, %v1372_v61  ;;  %v1382_v45 = vsel %vm3054_vm8, 0.0, %v1373_v36  ;;  %v1383_v47 = vsel %vm3054_vm8, 0.0, %v1374_v38 }
 0x2ef   : > { %v1384_v49 = vsel %vm3054_vm8, 0.0, %v1375_v25  ;;  %v1385_v51 = vsel %vm3054_vm8, 0.0, %v1376_v39  ;;  %v1599_v59 = vrot.slane %v1380_v40, %v2676_v42  ;;  %v1603_v60 = vrot.slane %v1381_v41, %v2676_v42  ;;  %v1588_v21 = vpop.permute.xlu1 %1587 }
 0x2f0   : > { %v1607_v1 = vrot.slane %v1382_v45, %v2676_v42  ;;  %v1611_v34 = vrot.slane %v1383_v47, %v2676_v42  ;;  %v1615_v4 = vrot.slane %v1384_v49, %v2676_v42  ;;  %v1619_v5 = vrot.slane %v1385_v51, %v2676_v42 }
 0x2f1   : > { %v1822_v6 = vsel %vm1812_vm10, %v1821_v16, 0.0  ;;  %v1751_v7 = vrot.slane %v1747_v0, %v2676_v42  ;;  %v1590_v19 = vmul.f32 %v1588_v21, %v1495_v46  ;;  %v1591_v24 = vmul.f32 %v1588_v21, %v1497_v20 }
 0x2f2   : > { %v1823_v27 = vadd.f32 %v1822_v6, %v1811_v9  ;;  %v1592_v28 = vmul.f32 %v1588_v21, %v1536_v50  ;;  %v1593_v54 = vmul.f32 %v1588_v21, %v1538_v58  ;;  %v1594_v31 = vmul.f32 %v1588_v21, %v1577_v23 }
 0x2f3   : > { %vm1752_vm14 = vcmp.eq.s32.totalorder %v1751_v7, 1  ;;  %v1595_v53 = vmul.f32 %v1588_v21, %v1579_v17  ;;  %v1620_v48 = vadd.f32 %v1599_v59, %v1590_v19  ;;  %v1621_v55 = vadd.f32 %v1603_v60, %v1591_v24  ;;  %v1832_v56 = vpop.permute.xlu1 %1831 }
 0x2f4   : > { %v1753_v12 = vsel %vm1752_vm14, %v2910_v8, %v3029_v37  ;;  %v1754_v14 = vsel %vm1752_vm14, %v2912_v10, %v3032_v32  ;;  %v1755_v16 = vsel %vm1752_vm14, %v2914_v11, %v3038_v29  ;;  %v1756_v46 = vsel %vm1752_vm14, %v2916_v13, %v3041_v26 }
 0x2f5   : > { %v1757_v20 = vsel %vm1752_vm14, %v2918_v18, %v3044_v30  ;;  %v1758_v9 = vsel %vm1752_vm14, %v2920_v22, %v3048_v44  ;;  %v1765_v50 = vcombine.low %v1753_v12, %v1754_v14  ;;  %v1766_v58 = vcombine.low %v1755_v16, %v1756_v46 }
 0x2f6   : > { %v1767_v23 = vcombine.low %v1757_v20, %v1758_v9  ;;  %v1622_v17 = vadd.f32 %v1607_v1, %v1592_v28  ;;  %v1623_v8 = vadd.f32 %v1611_v34, %v1593_v54  ;;  %v1624_v37 = vadd.f32 %v1615_v4, %v1594_v31 }
 0x2f7   : > { %v1625_v10 = vadd.f32 %v1619_v5, %v1595_v53  ;;  %v2069_v32 = vclamps-f32 %v1620_v48, 1.0  ;;  %v2070_v11 = vclamps-f32 %v1621_v55, 1.0  ;;  %v1826_v29 = vadd.f32 %v1825_v33, %v1823_v27  ;;  %v1845_v43 = vpop.permute.xlu1 %1844 }
 0x2f8   : > { %v2071_v13 = vclamps-f32 %v1622_v17, 1.0  ;;  %v2072_v26 = vclamps-f32 %v1623_v8, 1.0  ;;  %v2073_v57 = vclamps-f32 %v1624_v37, 1.0  ;;  %v1837_v18 = vrot.slane %v1832_v56, %v2676_v42 }
 0x2f9   : > { %v2074_v30 = vclamps-f32 %v1625_v10, 1.0  ;;  %1638 = vst [vmem:[#allocation7] sm:$0xff] %v2069_v32  ;;  %1639 = vst [vmem:[#allocation7 + $0x8] sm:$0xff] %v2070_v11  ;;  %v1850_v22 = vrot.slane %v1845_v43, %v2676_v42  ;;  %v1774_v44 = vrot.slane %v1765_v50, %v2904_v15  ;;  %v1781_v62 = vrot.slane %v1766_v58, %v2904_v15 }
 0x2fa   : > { %1640 = vst [vmem:[#allocation7 + $0x10] sm:$0xff] %v2071_v13  ;;  %1641 = vst [vmem:[#allocation7 + $0x18] sm:$0xff] %v2072_v26  ;;  %v1838_v33 = vsel %vm1827_vm12, %v1837_v18, 0.0  ;;  %v1788_v0 = vrot.slane %v1767_v23, %v2904_v15 }
 0x2fb   : > { %1642 = vst [vmem:[#allocation7 + $0x20] sm:$0xff] %v2073_v57  ;;  %1643 = vst [vmem:[#allocation7 + $0x28] sm:$0xff] %v2074_v30  ;;  %v1839_v2 = vadd.f32 %v1838_v33, %v1826_v29  ;;  %v1851_v63 = vsel %vm1840_vm13, %v1850_v22, 0.0  ;;  %v1789_v42 = vcombine.low %v1774_v44, %v1781_v62 }
 0x2fc   : > { %2344 = shalt.err (!%p2341_p4)
}
 0x2fd   : > { %s2345_s22 = scalar_lea.hbm %s3256_s13, 768 }
 0x2fe   : > { %p2346_p5 = scmp.ne.s32.totalorder %s3256_s13, %s2345_s22  ;;  %p2351_p8 = scmp.lt.u32.totalorder %s2345_s22, %s3256_s13 }
 0x300   : > { %p2347_p6 = pnand %p2346_p5, %p2173_p11 }
 0x302   : > { %p2348_p7 = pneg %p2347_p6 }
 0x304   : > { %p2353_p9 = pnand %p2351_p8, %p2348_p7 }
 0x306   : > { %2356 = shalt.err (!%p2353_p9)
}
 0x307   : > { %2154 = dma.vmem_to_hbm [thread:$0]  (%p2173_p11), %s1862_s1, 768, %s3256_s13, [#allocation8]   ;;  %v1852_v3 = vadd.f32 %v1851_v63, %v1839_v2  ;;  %v1796_v35 = vrot.slane %v1789_v42, %v2904_v15  ;;  %v1803_v61 = vrot.slane %v1788_v0, %v2904_v15 }
 0x308   : > { %s2441_s28 = smov [#allocation14]   ;;  %s2357_s25 = scalar_lea.vmem %s1895_s23, 96 }
 0x309   : > { %s1905_s24 = sshll.u32 %s2441_s28, 4  ;;  %1853 = vst [vmem:[#allocation14] sm:$0x1] %v1852_v3  ;;  %v1804_v36 = vcombine.low %v1796_v35, %v1803_v61  ;;  %p2358_p10 = scmp.ne.s32.totalorder %s1895_s23, %s2357_s25  ;;  %s3182_s24 = int_to_ptr.vmem [resolvable:$true] %s1905_s24 }
 0x30a   : > { %p2364_p0 = scmp.lt.s32.totalorder %s1895_s23, %s1895_s23  ;;  %p2365_p1 = scmp.lt.s32.totalorder %s2357_s25, %s2357_s25 }
 0x30b   : > { %1806 = vst.msk [vmem:[#allocation12] sm:$0x3f] %vm2963_vm5, %v1804_v36  ;;  %p2359_p12 = pnand %p2358_p10, %p2173_p11 }
 0x30c   : > { %p2366_p2 = por %p2365_p1, %p2364_p0 }
 0x30d   : > { %p2360_p13 = pneg %p2359_p12 }
 0x30f   : > { %p2367_p3 = pnand %p2366_p2, %p2360_p13 }
 0x311   : > { %2370 = shalt.err (!%p2367_p3)
}
 0x312   : > { %s2371_s22 = scalar_lea.hbm %s3259_s16, 96 }
 0x313   : > { %p2372_p4 = scmp.ne.s32.totalorder %s3259_s16, %s2371_s22  ;;  %p2377_p7 = scmp.lt.u32.totalorder %s2371_s22, %s3259_s16 }
 0x315   : > { %p2373_p5 = pnand %p2372_p4, %p2173_p11 }
 0x317   : > { %p2374_p6 = pneg %p2373_p5 }
 0x319   : > { %p2379_p8 = pnand %p2377_p7, %p2374_p6 }
 0x31b   : > { %2382 = shalt.err (!%p2379_p8)
}
 0x31c   : > { %2160 = dma.vmem_to_hbm [thread:$0]  (%p2173_p11), %s1895_s23, 96, %s3259_s16, [#allocation13]  }
 0x31d   : > { %s2383_s28 = scalar_lea.vmem %s3182_s24, 16  ;;  %s2389_s25 = scalar_lea.vmem %s3182_s24, 32 }
 0x31e   : > { %p2384_p9 = scmp.ne.s32.totalorder %s3182_s24, %s2383_s28  ;;  %p2390_p13 = scmp.lt.s32.totalorder %s3182_s24, %s3182_s24 }
 0x31f   : > { %p2391_p0 = scmp.lt.s32.totalorder %s2389_s25, %s2383_s28 }
 0x320   : > { %p2385_p10 = pnand %p2384_p9, %p2173_p11 }
 0x321   : > { %p2392_p1 = por %p2391_p0, %p2390_p13 }
 0x322   : > { %p2386_p12 = pneg %p2385_p10 }
 0x324   : > { %p2393_p2 = pnand %p2392_p1, %p2386_p12 }
 0x326   : > { %2396 = shalt.err (!%p2393_p2)
}
 0x327   : > { %s2397_s22 = scalar_lea.hbm %s3260_s17, 16 }
 0x328   : > { %p2398_p3 = scmp.ne.s32.totalorder %s3260_s17, %s2397_s22  ;;  %p2403_p6 = scmp.lt.u32.totalorder %s2397_s22, %s3260_s17 }
 0x32a   : > { %p2399_p4 = pnand %p2398_p3, %p2173_p11 }
 0x32c   : > { %p2400_p5 = pneg %p2399_p4 }
 0x32e   : > { %p2405_p7 = pnand %p2403_p6, %p2400_p5 }
 0x330   : > { %2408 = shalt.err (!%p2405_p7)
}
 0x331   : > { %2162 = dma.vmem_to_hbm [thread:$0]  (%p2173_p11), %s3182_s24, 16, %s3260_s17, [#allocation13]  }
 0x332   : > { %2416 = dma.done.wait (%p2173_p11), [#allocation8], 768  }
 0x333   : > { %2418 = vsyncadd (%p2173_p11), [#allocation8], 4294966528 }
 0x334   : > { %2420 = dma.done.wait (%p2173_p11), [#allocation10], 192  }
 0x335   : > { %2422 = vsyncadd (%p2173_p11), [#allocation10], 4294967104 }
 0x336   : > { %2424 = dma.done.wait (%p2173_p11), [#allocation13], 112  }
 0x337   : > { %2426 = vsyncadd (%p2173_p11), [#allocation13], 4294967184 }
 0x338 PF: > { %s37_s29 = sadd.s32 1, %s2429_s29  }
 0x339   : > { %p34_p8 = scmp.ge.s32.totalorder %s37_s29, 10  }
 0x33b   :  { %36 = sbr.rel (!%p34_p8) target bundleno = 25 (0x19), region = 134 }
 0x342   :  { %1934 = vsyncpa [#allocation8], 1 }
 0x343   :  { %1936 = vsyncpa [#allocation8 + $0x1], 1 }
 0x344   :  { %1937 = vsyncpa [#allocation10], 1 }
 0x345   :  { %1938 = vsyncpa [#allocation13], 1 }

</bundles_post_ra>
